<compile_context>
chip_gen: v7x
topology: tpu7x:2x2x1
jax: 0.10.0
libtpu: 0.0.40
codegen_flags: <defaults>
</compile_context>

<pallas_src>
import functools
import math

import jax
import jax.numpy as jnp
from jax import lax
from jax.experimental import pallas as pl
from jax.experimental.pallas import tpu as pltpu


def mha_kernel(q_ref, k_ref, v_ref, mask_ref,
               wq_ref, bq_ref, wk_ref, bk_ref,
               wv_ref, bv_ref, wo_ref, bo_ref,
               o_ref,
               kproj_ref, vproj_ref, ctx_ref,
               *, n_heads, d_k):
    f32 = jnp.float32
    bf16 = jnp.bfloat16
    neg_big = f32(-1.0e9)

    # --- K/V projections: computed once per batch element (qi == 0), cached in
    #     bf16 VMEM scratch, reused by every query tile of that element.
    #     Requires the qi grid axis to be "arbitrary" (sequential).
    @pl.when(pl.program_id(1) == 0)
    def _project_kv():
        k = k_ref[0].astype(bf16)                                       # (S, D)
        v = v_ref[0].astype(bf16)                                       # (S, D)
        kproj_ref[...] = (jnp.dot(k, wk_ref[...], preferred_element_type=f32)
                          + bk_ref[...]).astype(bf16)
        vproj_ref[...] = (jnp.dot(v, wv_ref[...], preferred_element_type=f32)
                          + bv_ref[...]).astype(bf16)

    # --- Q projection for this query tile.  NOTE: the 1/sqrt(d_k) scale is
    #     pre-folded into wq/bq by the wrapper, so no per-step scale here.
    q = q_ref[0].astype(bf16)                                           # (TQ, D)
    Qb = (jnp.dot(q, wq_ref[...], preferred_element_type=f32)
          + bq_ref[...]).astype(bf16)                                   # (TQ, D)
    Kb = kproj_ref[...]                                                 # (S, D) bf16
    Vb = vproj_ref[...]                                                 # (S, D) bf16

    # Hoisted mask compare (one compare; per-head work is only the select).
    mask_zero = mask_ref[...] == 0.0                                    # (TQ, S)

    # --- Per-head scores; contract the last dim of BOTH operands so no
    #     explicit K transpose / XLU relayout is needed.
    dn = (((1,), (1,)), ((), ()))
    scores = []
    for h in range(n_heads):
        lo, hi = h * d_k, (h + 1) * d_k
        s = lax.dot_general(Qb[:, lo:hi], Kb[:, lo:hi], dimension_numbers=dn,
                            preferred_element_type=f32)                 # (TQ, S)
        # Exact masked_fill(-1e9): identical constant for every head, so the
        # heads-axis softmax gives uniform 1/H at masked positions, exactly as
        # in the reference (an additive bias would NOT preserve this).
        scores.append(jnp.where(mask_zero, neg_big, s))

    # --- Softmax over the HEADS dimension (dim=1 of (B, H, Sq, Sk)), exactly
    #     as in the reference module.  exp overwrites the score buffers and
    #     the probabilities are consumed immediately below.
    m = scores[0]
    for h in range(1, n_heads):
        m = jnp.maximum(m, scores[h])
    scores = [jnp.exp(s - m) for s in scores]          # exp overwrites scores
    denom = scores[0]
    for h in range(1, n_heads):
        denom = denom + scores[h]
    inv_denom = pl.reciprocal(denom, approx=True)      # EUP slot, frees VPU

    # --- Per-head P@V into the columns of one (TQ, D) scratch ("concat"),
    #     then a SINGLE full-depth output projection.
    for h in range(n_heads):
        lo, hi = h * d_k, (h + 1) * d_k
        p_h = (scores[h] * inv_denom).astype(bf16)                      # (TQ, S)
        ctx_ref[:, lo:hi] = jnp.dot(p_h, Vb[:, lo:hi],
                                    preferred_element_type=f32)         # (TQ, d_k)

    o_ref[0] = (jnp.dot(ctx_ref[...].astype(bf16), wo_ref[...],
                        preferred_element_type=f32) + bo_ref[...])


def _vmem_and_tile_defaults():
    """Generation-aware VMEM request and query-tile cap.

    v7x has 64 MiB VMEM per TensorCore -> leave headroom (do not request it
    all); v5e/v6e have 128 MiB -> larger request and bigger query tiles to
    amortize per-grid-step overhead.
    """
    try:
        cap = int(pltpu.get_tpu_info().vmem_capacity_bytes)
    except Exception:
        cap = 64 * 1024 * 1024          # conservative (v7x-like) default
    if cap >= 128 * 1024 * 1024:        # v5e / v6e
        return 96 * 1024 * 1024, 256
    return 48 * 1024 * 1024, 128        # v7x


def multi_head_attention(q, k, v, mask, params, *, n_heads, tq=None):
    B, S, D = q.shape
    assert D % n_heads == 0
    d_k = D // n_heads

    vmem_limit, tq_cap = _vmem_and_tile_defaults()
    if tq is None:
        tq = S if S <= tq_cap else tq_cap
    assert S % tq == 0
    n_q_tiles = S // tq

    # Weights pre-cast to bf16 once (halves weight DMA / VMEM); the 1/sqrt(d_k)
    # score scale is folded into Wq and bq here (mathematically identical to
    # scaling the per-head score tiles), so the kernel applies no scale.
    inv_sqrt_dk = 1.0 / math.sqrt(d_k)
    bf16 = jnp.bfloat16
    wq = (params["wq"] * inv_sqrt_dk).astype(bf16)
    bq = params["bq"] * inv_sqrt_dk                    # biases stay f32
    wk = params["wk"].astype(bf16)
    wv = params["wv"].astype(bf16)
    wo = params["wo"].astype(bf16)
    bk, bv, bo = params["bk"], params["bv"], params["bo"]

    kernel = functools.partial(mha_kernel, n_heads=n_heads, d_k=d_k)

    def build_and_call(resident_mode):
        # Constant-index weight/bias blocks: single residency when supported
        # (double buffering buys nothing for a block that never changes).
        if resident_mode is None:
            mat_spec = pl.BlockSpec((D, D), lambda b, qi: (0, 0))
            bias_spec = pl.BlockSpec((1, D), lambda b, qi: (0, 0))
        else:
            mat_spec = pl.BlockSpec((D, D), lambda b, qi: (0, 0),
                                    pipeline_mode=resident_mode)
            bias_spec = pl.BlockSpec((1, D), lambda b, qi: (0, 0),
                                     pipeline_mode=resident_mode)
        q_spec = pl.BlockSpec((1, tq, D), lambda b, qi: (b, qi, 0))
        kv_spec = pl.BlockSpec((1, S, D), lambda b, qi: (b, 0, 0))
        mask_spec = pl.BlockSpec((tq, S), lambda b, qi: (qi, 0))
        out_spec = pl.BlockSpec((1, tq, D), lambda b, qi: (b, qi, 0))

        fn = pl.pallas_call(
            kernel,
            out_shape=jax.ShapeDtypeStruct((B, S, D), jnp.float32),
            grid_spec=pltpu.PrefetchScalarGridSpec(
                num_scalar_prefetch=0,
                grid=(B, n_q_tiles),
                in_specs=[
                    q_spec, kv_spec, kv_spec, mask_spec,
                    mat_spec, bias_spec,   # Wq, bq
                    mat_spec, bias_spec,   # Wk, bk
                    mat_spec, bias_spec,   # Wv, bv
                    mat_spec, bias_spec,   # Wo, bo
                ],
                out_specs=out_spec,
                scratch_shapes=[
                    pltpu.VMEM((S, D), bf16),          # cached K projection
                    pltpu.VMEM((S, D), bf16),          # cached V projection
                    pltpu.VMEM((tq, D), jnp.float32),  # per-head ctx "concat"
                ],
            ),
            compiler_params=pltpu.CompilerParams(
                # batch is parallel (megacore sharding on v7x); qi MUST be
                # arbitrary so the scratch-cached K/V projections stay valid.
                dimension_semantics=("parallel", "arbitrary"),
                vmem_limit_bytes=vmem_limit),
        )
        return fn(q, k, v, mask, wq, bq, wk, bk, wv, bv, wo, bo)

    try:
        return jax.block_until_ready(build_and_call(pl.Buffered(1)))
    except Exception:
        # pipeline_mode/Buffered(1) unsupported on this build -> default
        # double buffering (correctness identical, slightly more VMEM).
        return jax.block_until_ready(build_and_call(None))


def mha_reference(q, k, v, mask, params, *, n_heads):
    """Plain-JAX (f32) replica of the PyTorch forward for verification."""
    B, S, D = q.shape
    d_k = D // n_heads
    Q = q @ params["wq"] + params["bq"]
    K = k @ params["wk"] + params["bk"]
    V = v @ params["wv"] + params["bv"]
    Qh = Q.reshape(B, S, n_heads, d_k).transpose(0, 2, 1, 3)
    Kh = K.reshape(B, S, n_heads, d_k).transpose(0, 2, 1, 3)
    Vh = V.reshape(B, S, n_heads, d_k).transpose(0, 2, 1, 3)
    scores = Qh @ Kh.transpose(0, 1, 3, 2) / math.sqrt(d_k)
    scores = jnp.where(mask[None, None, :, :] == 0, -1.0e9, scores)
    p = jax.nn.softmax(scores, axis=1)  # dim=1 == heads, as in the reference
    x = p @ Vh
    x = x.transpose(0, 2, 1, 3).reshape(B, S, D)
    return x @ params["wo"] + params["bo"]


def init_params(key, d_model):
    bound = 1.0 / math.sqrt(d_model)
    names = ["wq", "bq", "wk", "bk", "wv", "bv", "wo", "bo"]
    keys = jax.random.split(key, len(names))
    params = {}
    for name, kk in zip(names, keys):
        shape = (d_model, d_model) if name.startswith("w") else (1, d_model)
        params[name] = jax.random.uniform(
            kk, shape, dtype=jnp.float32, minval=-bound, maxval=bound)
    return params


if __name__ == "__main__":
    # Small demo shapes; S=16 with tq=8 exercises the query-tiled grid axis
    # and the qi==0 K/V-projection caching path.
    B, S, d_model, n_heads = 2, 16, 32, 4

    root = jax.random.PRNGKey(0)
    kq, kk, kv, kp = jax.random.split(root, 4)
    q = jax.random.normal(kq, (B, S, d_model), dtype=jnp.float32)
    k = jax.random.normal(kk, (B, S, d_model), dtype=jnp.float32)
    v = jax.random.normal(kv, (B, S, d_model), dtype=jnp.float32)
    # Causal mask (1 = keep, 0 = fill with -1e9), broadcast over batch & heads.
    mask = jnp.tril(jnp.ones((S, S), dtype=jnp.float32))

    params = init_params(kp, d_model)

    out = multi_head_attention(q, k, v, mask, params, n_heads=n_heads, tq=8)
    out = jax.block_until_ready(out)

    ref = mha_reference(q, k, v, mask, params, n_heads=n_heads)
    assert out.shape == (B, S, d_model)
    # Tolerance loosened for bf16 MXU operands (f32 accumulation) and the
    # EUP approximate reciprocal in the softmax.
    assert jnp.allclose(out, ref, atol=5e-2, rtol=5e-2)

    print("KERNEL_OK")
</pallas_src>

<mosaic_0001>
module attributes {stable_mosaic.version = 11 : i64} {
  func.func @mha_kernel(%arg0: i32, %arg1: i32, %arg2: memref<1x8x32xf32, #tpu.memory_space<vmem>>, %arg3: memref<1x16x32xf32, #tpu.memory_space<vmem>>, %arg4: memref<1x16x32xf32, #tpu.memory_space<vmem>>, %arg5: memref<8x16xf32, #tpu.memory_space<vmem>>, %arg6: memref<32x32xbf16, #tpu.memory_space<vmem>>, %arg7: memref<1x32xf32, #tpu.memory_space<vmem>>, %arg8: memref<32x32xbf16, #tpu.memory_space<vmem>>, %arg9: memref<1x32xf32, #tpu.memory_space<vmem>>, %arg10: memref<32x32xbf16, #tpu.memory_space<vmem>>, %arg11: memref<1x32xf32, #tpu.memory_space<vmem>>, %arg12: memref<32x32xbf16, #tpu.memory_space<vmem>>, %arg13: memref<1x32xf32, #tpu.memory_space<vmem>>, %arg14: memref<1x8x32xf32, #tpu.memory_space<vmem>>, %arg15: memref<16x32xbf16, #tpu.memory_space<vmem>>, %arg16: memref<16x32xbf16, #tpu.memory_space<vmem>>, %arg17: memref<8x32xf32, #tpu.memory_space<vmem>>) attributes {dimension_semantics = [#tpu.dimension_semantics<parallel>, #tpu.dimension_semantics<arbitrary>], iteration_bounds = array<i64: 2, 2>, scalar_prefetch = 0 : i64, scratch_operands = 3 : i64, tpu.core_type = #tpu.core_type<tc>, window_params = [{transform_indices = @transform_0, window_bounds = array<i64: 1, 8, 32>}, {transform_indices = @transform_1, window_bounds = array<i64: 1, 16, 32>}, {transform_indices = @transform_2, window_bounds = array<i64: 1, 16, 32>}, {transform_indices = @transform_3, window_bounds = array<i64: 8, 16>}, {pipeline_mode = #tpu.pipeline_mode<synchronous>, transform_indices = @transform_4, window_bounds = array<i64: 32, 32>}, {pipeline_mode = #tpu.pipeline_mode<synchronous>, transform_indices = @transform_5, window_bounds = array<i64: 1, 32>}, {pipeline_mode = #tpu.pipeline_mode<synchronous>, transform_indices = @transform_6, window_bounds = array<i64: 32, 32>}, {pipeline_mode = #tpu.pipeline_mode<synchronous>, transform_indices = @transform_7, window_bounds = array<i64: 1, 32>}, {pipeline_mode = #tpu.pipeline_mode<synchronous>, transform_indices = @transform_8, window_bounds = array<i64: 32, 32>}, {pipeline_mode = #tpu.pipeline_mode<synchronous>, transform_indices = @transform_9, window_bounds = array<i64: 1, 32>}, {pipeline_mode = #tpu.pipeline_mode<synchronous>, transform_indices = @transform_10, window_bounds = array<i64: 32, 32>}, {pipeline_mode = #tpu.pipeline_mode<synchronous>, transform_indices = @transform_11, window_bounds = array<i64: 1, 32>}, {transform_indices = @transform_12, window_bounds = array<i64: 1, 8, 32>}]} {
    %c0_i32 = arith.constant 0 : i32
    %0 = arith.cmpi eq, %arg1, %c0_i32 : i32
    %1 = arith.extui %0 : i1 to i32
    %c0_i32_0 = arith.constant 0 : i32
    %2 = arith.cmpi ne, %1, %c0_i32_0 : i32
    scf.if %2 {
      %c0_41 = arith.constant 0 : index
      %c0_42 = arith.constant 0 : index
      %c0_43 = arith.constant 0 : index
      %82 = vector.load %arg3[%c0_41, %c0_42, %c0_43] : memref<1x16x32xf32, #tpu.memory_space<vmem>>, vector<1x16x32xf32>
      %83 = vector.shape_cast %82 : vector<1x16x32xf32> to vector<16x32xf32>
      %84 = arith.truncf %83 : vector<16x32xf32> to vector<16x32xbf16>
      %c0_44 = arith.constant 0 : index
      %c0_45 = arith.constant 0 : index
      %c0_46 = arith.constant 0 : index
      %85 = vector.load %arg4[%c0_44, %c0_45, %c0_46] : memref<1x16x32xf32, #tpu.memory_space<vmem>>, vector<1x16x32xf32>
      %86 = vector.shape_cast %85 : vector<1x16x32xf32> to vector<16x32xf32>
      %87 = arith.truncf %86 : vector<16x32xf32> to vector<16x32xbf16>
      %c0_47 = arith.constant 0 : index
      %c0_48 = arith.constant 0 : index
      %88 = vector.load %arg8[%c0_47, %c0_48] : memref<32x32xbf16, #tpu.memory_space<vmem>>, vector<32x32xbf16>
      %cst_49 = arith.constant dense<0.000000e+00> : vector<16x32xf32>
      %89 = tpu.matmul %84, %88, %cst_49 {dimension_numbers = #tpu.dot_dimension_numbers<[1], [0], [0], [1], [0, 0, 1, 1], [], []>} : vector<16x32xbf16>, vector<32x32xbf16>, vector<16x32xf32> -> vector<16x32xf32>
      %c0_50 = arith.constant 0 : index
      %c0_51 = arith.constant 0 : index
      %90 = vector.load %arg9[%c0_50, %c0_51] : memref<1x32xf32, #tpu.memory_space<vmem>>, vector<1x32xf32>
      %91 = vector.broadcast %90 : vector<1x32xf32> to vector<16x32xf32>
      %92 = arith.addf %89, %91 : vector<16x32xf32>
      %93 = arith.truncf %92 : vector<16x32xf32> to vector<16x32xbf16>
      %c0_52 = arith.constant 0 : index
      %c0_53 = arith.constant 0 : index
      %94 = vector.load %arg15[%c0_52, %c0_53] : memref<16x32xbf16, #tpu.memory_space<vmem>>, vector<16x32xbf16>
      tpu.vector_store %arg15[%c0_52, %c0_53], %93 {strides = array<i32>} : memref<16x32xbf16, #tpu.memory_space<vmem>>, vector<16x32xbf16>,
      %c0_54 = arith.constant 0 : index
      %c0_55 = arith.constant 0 : index
      %95 = vector.load %arg10[%c0_54, %c0_55] : memref<32x32xbf16, #tpu.memory_space<vmem>>, vector<32x32xbf16>
      %cst_56 = arith.constant dense<0.000000e+00> : vector<16x32xf32>
      %96 = tpu.matmul %87, %95, %cst_56 {dimension_numbers = #tpu.dot_dimension_numbers<[1], [0], [0], [1], [0, 0, 1, 1], [], []>} : vector<16x32xbf16>, vector<32x32xbf16>, vector<16x32xf32> -> vector<16x32xf32>
      %c0_57 = arith.constant 0 : index
      %c0_58 = arith.constant 0 : index
      %97 = vector.load %arg11[%c0_57, %c0_58] : memref<1x32xf32, #tpu.memory_space<vmem>>, vector<1x32xf32>
      %98 = vector.broadcast %97 : vector<1x32xf32> to vector<16x32xf32>
      %99 = arith.addf %96, %98 : vector<16x32xf32>
      %100 = arith.truncf %99 : vector<16x32xf32> to vector<16x32xbf16>
      %c0_59 = arith.constant 0 : index
      %c0_60 = arith.constant 0 : index
      %101 = vector.load %arg16[%c0_59, %c0_60] : memref<16x32xbf16, #tpu.memory_space<vmem>>, vector<16x32xbf16>
      tpu.vector_store %arg16[%c0_59, %c0_60], %100 {strides = array<i32>} : memref<16x32xbf16, #tpu.memory_space<vmem>>, vector<16x32xbf16>,
    } else {
    }
    %c0 = arith.constant 0 : index
    %c0_1 = arith.constant 0 : index
    %c0_2 = arith.constant 0 : index
    %3 = vector.load %arg2[%c0, %c0_1, %c0_2] : memref<1x8x32xf32, #tpu.memory_space<vmem>>, vector<1x8x32xf32>
    %4 = vector.shape_cast %3 : vector<1x8x32xf32> to vector<8x32xf32>
    %5 = arith.truncf %4 : vector<8x32xf32> to vector<8x32xbf16>
    %c0_3 = arith.constant 0 : index
    %c0_4 = arith.constant 0 : index
    %6 = vector.load %arg6[%c0_3, %c0_4] : memref<32x32xbf16, #tpu.memory_space<vmem>>, vector<32x32xbf16>
    %cst = arith.constant dense<0.000000e+00> : vector<8x32xf32>
    %7 = tpu.matmul %5, %6, %cst {dimension_numbers = #tpu.dot_dimension_numbers<[1], [0], [0], [1], [0, 0, 1, 1], [], []>} : vector<8x32xbf16>, vector<32x32xbf16>, vector<8x32xf32> -> vector<8x32xf32>
    %c0_5 = arith.constant 0 : index
    %c0_6 = arith.constant 0 : index
    %8 = vector.load %arg7[%c0_5, %c0_6] : memref<1x32xf32, #tpu.memory_space<vmem>>, vector<1x32xf32>
    %9 = vector.broadcast %8 : vector<1x32xf32> to vector<8x32xf32>
    %10 = arith.addf %7, %9 : vector<8x32xf32>
    %11 = arith.truncf %10 : vector<8x32xf32> to vector<8x32xbf16>
    %c0_7 = arith.constant 0 : index
    %c0_8 = arith.constant 0 : index
    %12 = vector.load %arg15[%c0_7, %c0_8] : memref<16x32xbf16, #tpu.memory_space<vmem>>, vector<16x32xbf16>
    %c0_9 = arith.constant 0 : index
    %c0_10 = arith.constant 0 : index
    %13 = vector.load %arg16[%c0_9, %c0_10] : memref<16x32xbf16, #tpu.memory_space<vmem>>, vector<16x32xbf16>
    %c0_11 = arith.constant 0 : index
    %c0_12 = arith.constant 0 : index
    %14 = vector.load %arg5[%c0_11, %c0_12] : memref<8x16xf32, #tpu.memory_space<vmem>>, vector<8x16xf32>
    %cst_13 = arith.constant 0.000000e+00 : f32
    %15 = vector.broadcast %cst_13 : f32 to vector<8x16xf32>
    %16 = arith.cmpf oeq, %14, %15 : vector<8x16xf32>
    %17 = vector.extract_strided_slice %11 {offsets = [0, 0], sizes = [8, 8], strides = [1, 1]} : vector<8x32xbf16> to vector<8x8xbf16>
    %18 = vector.extract_strided_slice %12 {offsets = [0, 0], sizes = [16, 8], strides = [1, 1]} : vector<16x32xbf16> to vector<16x8xbf16>
    %cst_14 = arith.constant dense<0.000000e+00> : vector<8x16xf32>
    %19 = tpu.matmul %17, %18, %cst_14 {dimension_numbers = #tpu.dot_dimension_numbers<[1], [1], [0], [0], [0, 0, 1, 0], [], []>} : vector<8x8xbf16>, vector<16x8xbf16>, vector<8x16xf32> -> vector<8x16xf32>
    %cst_15 = arith.constant -1.000000e+09 : f32
    %20 = vector.broadcast %cst_15 : f32 to vector<8x16xf32>
    %21 = arith.select %16, %20, %19 : vector<8x16xi1>, vector<8x16xf32>
    %22 = vector.extract_strided_slice %11 {offsets = [0, 8], sizes = [8, 8], strides = [1, 1]} : vector<8x32xbf16> to vector<8x8xbf16>
    %23 = vector.extract_strided_slice %12 {offsets = [0, 8], sizes = [16, 8], strides = [1, 1]} : vector<16x32xbf16> to vector<16x8xbf16>
    %cst_16 = arith.constant dense<0.000000e+00> : vector<8x16xf32>
    %24 = tpu.matmul %22, %23, %cst_16 {dimension_numbers = #tpu.dot_dimension_numbers<[1], [1], [0], [0], [0, 0, 1, 0], [], []>} : vector<8x8xbf16>, vector<16x8xbf16>, vector<8x16xf32> -> vector<8x16xf32>
    %cst_17 = arith.constant -1.000000e+09 : f32
    %25 = vector.broadcast %cst_17 : f32 to vector<8x16xf32>
    %26 = arith.select %16, %25, %24 : vector<8x16xi1>, vector<8x16xf32>
    %27 = vector.extract_strided_slice %11 {offsets = [0, 16], sizes = [8, 8], strides = [1, 1]} : vector<8x32xbf16> to vector<8x8xbf16>
    %28 = vector.extract_strided_slice %12 {offsets = [0, 16], sizes = [16, 8], strides = [1, 1]} : vector<16x32xbf16> to vector<16x8xbf16>
    %cst_18 = arith.constant dense<0.000000e+00> : vector<8x16xf32>
    %29 = tpu.matmul %27, %28, %cst_18 {dimension_numbers = #tpu.dot_dimension_numbers<[1], [1], [0], [0], [0, 0, 1, 0], [], []>} : vector<8x8xbf16>, vector<16x8xbf16>, vector<8x16xf32> -> vector<8x16xf32>
    %cst_19 = arith.constant -1.000000e+09 : f32
    %30 = vector.broadcast %cst_19 : f32 to vector<8x16xf32>
    %31 = arith.select %16, %30, %29 : vector<8x16xi1>, vector<8x16xf32>
    %32 = vector.extract_strided_slice %11 {offsets = [0, 24], sizes = [8, 8], strides = [1, 1]} : vector<8x32xbf16> to vector<8x8xbf16>
    %33 = vector.extract_strided_slice %12 {offsets = [0, 24], sizes = [16, 8], strides = [1, 1]} : vector<16x32xbf16> to vector<16x8xbf16>
    %cst_20 = arith.constant dense<0.000000e+00> : vector<8x16xf32>
    %34 = tpu.matmul %32, %33, %cst_20 {dimension_numbers = #tpu.dot_dimension_numbers<[1], [1], [0], [0], [0, 0, 1, 0], [], []>} : vector<8x8xbf16>, vector<16x8xbf16>, vector<8x16xf32> -> vector<8x16xf32>
    %cst_21 = arith.constant -1.000000e+09 : f32
    %35 = vector.broadcast %cst_21 : f32 to vector<8x16xf32>
    %36 = arith.select %16, %35, %34 : vector<8x16xi1>, vector<8x16xf32>
    %37 = arith.maximumf %21, %26 : vector<8x16xf32>
    %38 = arith.maximumf %37, %31 : vector<8x16xf32>
    %39 = arith.maximumf %38, %36 : vector<8x16xf32>
    %40 = arith.subf %21, %39 : vector<8x16xf32>
    %41 = math.exp %40 : vector<8x16xf32>
    %42 = arith.subf %26, %39 : vector<8x16xf32>
    %43 = math.exp %42 : vector<8x16xf32>
    %44 = arith.subf %31, %39 : vector<8x16xf32>
    %45 = math.exp %44 : vector<8x16xf32>
    %46 = arith.subf %36, %39 : vector<8x16xf32>
    %47 = math.exp %46 : vector<8x16xf32>
    %48 = arith.addf %41, %43 : vector<8x16xf32>
    %49 = arith.addf %48, %45 : vector<8x16xf32>
    %50 = arith.addf %49, %47 : vector<8x16xf32>
    %51 = tpu.reciprocal %50 {approx = true} : vector<8x16xf32> -> vector<8x16xf32>
    %52 = arith.mulf %41, %51 : vector<8x16xf32>
    %53 = arith.truncf %52 : vector<8x16xf32> to vector<8x16xbf16>
    %54 = vector.extract_strided_slice %13 {offsets = [0, 0], sizes = [16, 8], strides = [1, 1]} : vector<16x32xbf16> to vector<16x8xbf16>
    %cst_22 = arith.constant dense<0.000000e+00> : vector<8x8xf32>
    %55 = tpu.matmul %53, %54, %cst_22 {dimension_numbers = #tpu.dot_dimension_numbers<[1], [0], [0], [1], [0, 0, 1, 1], [], []>} : vector<8x16xbf16>, vector<16x8xbf16>, vector<8x8xf32> -> vector<8x8xf32>
    %c0_23 = arith.constant 0 : index
    %c0_24 = arith.constant 0 : index
    %56 = vector.load %arg17[%c0_23, %c0_24] : memref<8x32xf32, #tpu.memory_space<vmem>>, vector<8x8xf32>
    tpu.vector_store %arg17[%c0_23, %c0_24], %55 {strides = array<i32>} : memref<8x32xf32, #tpu.memory_space<vmem>>, vector<8x8xf32>,
    %57 = arith.mulf %43, %51 : vector<8x16xf32>
    %58 = arith.truncf %57 : vector<8x16xf32> to vector<8x16xbf16>
    %59 = vector.extract_strided_slice %13 {offsets = [0, 8], sizes = [16, 8], strides = [1, 1]} : vector<16x32xbf16> to vector<16x8xbf16>
    %cst_25 = arith.constant dense<0.000000e+00> : vector<8x8xf32>
    %60 = tpu.matmul %58, %59, %cst_25 {dimension_numbers = #tpu.dot_dimension_numbers<[1], [0], [0], [1], [0, 0, 1, 1], [], []>} : vector<8x16xbf16>, vector<16x8xbf16>, vector<8x8xf32> -> vector<8x8xf32>
    %c0_26 = arith.constant 0 : index
    %c8 = arith.constant 8 : index
    %61 = vector.load %arg17[%c0_26, %c8] : memref<8x32xf32, #tpu.memory_space<vmem>>, vector<8x8xf32>
    tpu.vector_store %arg17[%c0_26, %c8], %60 {strides = array<i32>} : memref<8x32xf32, #tpu.memory_space<vmem>>, vector<8x8xf32>,
    %62 = arith.mulf %45, %51 : vector<8x16xf32>
    %63 = arith.truncf %62 : vector<8x16xf32> to vector<8x16xbf16>
    %64 = vector.extract_strided_slice %13 {offsets = [0, 16], sizes = [16, 8], strides = [1, 1]} : vector<16x32xbf16> to vector<16x8xbf16>
    %cst_27 = arith.constant dense<0.000000e+00> : vector<8x8xf32>
    %65 = tpu.matmul %63, %64, %cst_27 {dimension_numbers = #tpu.dot_dimension_numbers<[1], [0], [0], [1], [0, 0, 1, 1], [], []>} : vector<8x16xbf16>, vector<16x8xbf16>, vector<8x8xf32> -> vector<8x8xf32>
    %c0_28 = arith.constant 0 : index
    %c16 = arith.constant 16 : index
    %66 = vector.load %arg17[%c0_28, %c16] : memref<8x32xf32, #tpu.memory_space<vmem>>, vector<8x8xf32>
    tpu.vector_store %arg17[%c0_28, %c16], %65 {strides = array<i32>} : memref<8x32xf32, #tpu.memory_space<vmem>>, vector<8x8xf32>,
    %67 = arith.mulf %47, %51 : vector<8x16xf32>
    %68 = arith.truncf %67 : vector<8x16xf32> to vector<8x16xbf16>
    %69 = vector.extract_strided_slice %13 {offsets = [0, 24], sizes = [16, 8], strides = [1, 1]} : vector<16x32xbf16> to vector<16x8xbf16>
    %cst_29 = arith.constant dense<0.000000e+00> : vector<8x8xf32>
    %70 = tpu.matmul %68, %69, %cst_29 {dimension_numbers = #tpu.dot_dimension_numbers<[1], [0], [0], [1], [0, 0, 1, 1], [], []>} : vector<8x16xbf16>, vector<16x8xbf16>, vector<8x8xf32> -> vector<8x8xf32>
    %c0_30 = arith.constant 0 : index
    %c24 = arith.constant 24 : index
    %71 = vector.load %arg17[%c0_30, %c24] : memref<8x32xf32, #tpu.memory_space<vmem>>, vector<8x8xf32>
    tpu.vector_store %arg17[%c0_30, %c24], %70 {strides = array<i32>} : memref<8x32xf32, #tpu.memory_space<vmem>>, vector<8x8xf32>,
    %c0_31 = arith.constant 0 : index
    %c0_32 = arith.constant 0 : index
    %72 = vector.load %arg17[%c0_31, %c0_32] : memref<8x32xf32, #tpu.memory_space<vmem>>, vector<8x32xf32>
    %73 = arith.truncf %72 : vector<8x32xf32> to vector<8x32xbf16>
    %c0_33 = arith.constant 0 : index
    %c0_34 = arith.constant 0 : index
    %74 = vector.load %arg12[%c0_33, %c0_34] : memref<32x32xbf16, #tpu.memory_space<vmem>>, vector<32x32xbf16>
    %cst_35 = arith.constant dense<0.000000e+00> : vector<8x32xf32>
    %75 = tpu.matmul %73, %74, %cst_35 {dimension_numbers = #tpu.dot_dimension_numbers<[1], [0], [0], [1], [0, 0, 1, 1], [], []>} : vector<8x32xbf16>, vector<32x32xbf16>, vector<8x32xf32> -> vector<8x32xf32>
    %c0_36 = arith.constant 0 : index
    %c0_37 = arith.constant 0 : index
    %76 = vector.load %arg13[%c0_36, %c0_37] : memref<1x32xf32, #tpu.memory_space<vmem>>, vector<1x32xf32>
    %77 = vector.broadcast %76 : vector<1x32xf32> to vector<8x32xf32>
    %78 = arith.addf %75, %77 : vector<8x32xf32>
    %c0_38 = arith.constant 0 : index
    %c0_39 = arith.constant 0 : index
    %c0_40 = arith.constant 0 : index
    %79 = vector.load %arg14[%c0_38, %c0_39, %c0_40] : memref<1x8x32xf32, #tpu.memory_space<vmem>>, vector<1x8x32xf32>
    %80 = vector.shape_cast %79 : vector<1x8x32xf32> to vector<8x32xf32>
    %81 = vector.shape_cast %78 : vector<8x32xf32> to vector<1x8x32xf32>
    tpu.vector_store %arg14[%c0_38, %c0_39, %c0_40], %81 {strides = array<i32>} : memref<1x8x32xf32, #tpu.memory_space<vmem>>, vector<1x8x32xf32>,
    return
  }
  func.func @transform_0(%arg0: i32, %arg1: i32) -> (i32, i32, i32) {
    %c0_i32 = arith.constant 0 : i32
    %c0_i32_0 = arith.constant 0 : i32
    return %arg0, %arg1, %c0_i32 : i32, i32, i32
  }
  func.func @transform_1(%arg0: i32, %arg1: i32) -> (i32, i32, i32) {
    %c0_i32 = arith.constant 0 : i32
    %c0_i32_0 = arith.constant 0 : i32
    %c0_i32_1 = arith.constant 0 : i32
    return %arg0, %c0_i32, %c0_i32_0 : i32, i32, i32
  }
  func.func @transform_2(%arg0: i32, %arg1: i32) -> (i32, i32, i32) {
    %c0_i32 = arith.constant 0 : i32
    %c0_i32_0 = arith.constant 0 : i32
    %c0_i32_1 = arith.constant 0 : i32
    return %arg0, %c0_i32, %c0_i32_0 : i32, i32, i32
  }
  func.func @transform_3(%arg0: i32, %arg1: i32) -> (i32, i32) {
    %c0_i32 = arith.constant 0 : i32
    %c0_i32_0 = arith.constant 0 : i32
    return %arg1, %c0_i32 : i32, i32
  }
  func.func @transform_4(%arg0: i32, %arg1: i32) -> (i32, i32) {
    %c0_i32 = arith.constant 0 : i32
    %c0_i32_0 = arith.constant 0 : i32
    %c0_i32_1 = arith.constant 0 : i32
    return %c0_i32, %c0_i32_0 : i32, i32
  }
  func.func @transform_5(%arg0: i32, %arg1: i32) -> (i32, i32) {
    %c0_i32 = arith.constant 0 : i32
    %c0_i32_0 = arith.constant 0 : i32
    %c0_i32_1 = arith.constant 0 : i32
    return %c0_i32, %c0_i32_0 : i32, i32
  }
  func.func @transform_6(%arg0: i32, %arg1: i32) -> (i32, i32) {
    %c0_i32 = arith.constant 0 : i32
    %c0_i32_0 = arith.constant 0 : i32
    %c0_i32_1 = arith.constant 0 : i32
    return %c0_i32, %c0_i32_0 : i32, i32
  }
  func.func @transform_7(%arg0: i32, %arg1: i32) -> (i32, i32) {
    %c0_i32 = arith.constant 0 : i32
    %c0_i32_0 = arith.constant 0 : i32
    %c0_i32_1 = arith.constant 0 : i32
    return %c0_i32, %c0_i32_0 : i32, i32
  }
  func.func @transform_8(%arg0: i32, %arg1: i32) -> (i32, i32) {
    %c0_i32 = arith.constant 0 : i32
    %c0_i32_0 = arith.constant 0 : i32
    %c0_i32_1 = arith.constant 0 : i32
    return %c0_i32, %c0_i32_0 : i32, i32
  }
  func.func @transform_9(%arg0: i32, %arg1: i32) -> (i32, i32) {
    %c0_i32 = arith.constant 0 : i32
    %c0_i32_0 = arith.constant 0 : i32
    %c0_i32_1 = arith.constant 0 : i32
    return %c0_i32, %c0_i32_0 : i32, i32
  }
  func.func @transform_10(%arg0: i32, %arg1: i32) -> (i32, i32) {
    %c0_i32 = arith.constant 0 : i32
    %c0_i32_0 = arith.constant 0 : i32
    %c0_i32_1 = arith.constant 0 : i32
    return %c0_i32, %c0_i32_0 : i32, i32
  }
  func.func @transform_11(%arg0: i32, %arg1: i32) -> (i32, i32) {
    %c0_i32 = arith.constant 0 : i32
    %c0_i32_0 = arith.constant 0 : i32
    %c0_i32_1 = arith.constant 0 : i32
    return %c0_i32, %c0_i32_0 : i32, i32
  }
  func.func @transform_12(%arg0: i32, %arg1: i32) -> (i32, i32, i32) {
    %c0_i32 = arith.constant 0 : i32
    %c0_i32_0 = arith.constant 0 : i32
    return %arg0, %arg1, %c0_i32 : i32, i32, i32
  }
}

module attributes {stable_mosaic.version = 11 : i64} {
  func.func @mha_kernel(%arg0: i32, %arg1: i32, %arg2: memref<1x8x32xf32, #tpu.memory_space<vmem>>, %arg3: memref<1x16x32xf32, #tpu.memory_space<vmem>>, %arg4: memref<1x16x32xf32, #tpu.memory_space<vmem>>, %arg5: memref<8x16xf32, #tpu.memory_space<vmem>>, %arg6: memref<32x32xbf16, #tpu.memory_space<vmem>>, %arg7: memref<1x32xf32, #tpu.memory_space<vmem>>, %arg8: memref<32x32xbf16, #tpu.memory_space<vmem>>, %arg9: memref<1x32xf32, #tpu.memory_space<vmem>>, %arg10: memref<32x32xbf16, #tpu.memory_space<vmem>>, %arg11: memref<1x32xf32, #tpu.memory_space<vmem>>, %arg12: memref<32x32xbf16, #tpu.memory_space<vmem>>, %arg13: memref<1x32xf32, #tpu.memory_space<vmem>>, %arg14: memref<1x8x32xf32, #tpu.memory_space<vmem>>, %arg15: memref<16x32xbf16, #tpu.memory_space<vmem>>, %arg16: memref<16x32xbf16, #tpu.memory_space<vmem>>, %arg17: memref<8x32xf32, #tpu.memory_space<vmem>>) attributes {dimension_semantics = [#tpu.dimension_semantics<parallel>, #tpu.dimension_semantics<arbitrary>], iteration_bounds = array<i64: 2, 2>, scalar_prefetch = 0 : i64, scratch_operands = 3 : i64, tpu.core_type = #tpu.core_type<tc>, window_params = [{transform_indices = @transform_0, window_bounds = array<i64: 1, 8, 32>}, {transform_indices = @transform_1, window_bounds = array<i64: 1, 16, 32>}, {transform_indices = @transform_2, window_bounds = array<i64: 1, 16, 32>}, {transform_indices = @transform_3, window_bounds = array<i64: 8, 16>}, {pipeline_mode = #tpu.pipeline_mode<synchronous>, transform_indices = @transform_4, window_bounds = array<i64: 32, 32>}, {pipeline_mode = #tpu.pipeline_mode<synchronous>, transform_indices = @transform_5, window_bounds = array<i64: 1, 32>}, {pipeline_mode = #tpu.pipeline_mode<synchronous>, transform_indices = @transform_6, window_bounds = array<i64: 32, 32>}, {pipeline_mode = #tpu.pipeline_mode<synchronous>, transform_indices = @transform_7, window_bounds = array<i64: 1, 32>}, {pipeline_mode = #tpu.pipeline_mode<synchronous>, transform_indices = @transform_8, window_bounds = array<i64: 32, 32>}, {pipeline_mode = #tpu.pipeline_mode<synchronous>, transform_indices = @transform_9, window_bounds = array<i64: 1, 32>}, {pipeline_mode = #tpu.pipeline_mode<synchronous>, transform_indices = @transform_10, window_bounds = array<i64: 32, 32>}, {pipeline_mode = #tpu.pipeline_mode<synchronous>, transform_indices = @transform_11, window_bounds = array<i64: 1, 32>}, {transform_indices = @transform_12, window_bounds = array<i64: 1, 8, 32>}]} {
    %c0_i32 = arith.constant 0 : i32
    %0 = arith.cmpi eq, %arg1, %c0_i32 : i32
    %1 = arith.extui %0 : i1 to i32
    %c0_i32_0 = arith.constant 0 : i32
    %2 = arith.cmpi ne, %1, %c0_i32_0 : i32
    scf.if %2 {
      %c0_41 = arith.constant 0 : index
      %c0_42 = arith.constant 0 : index
      %c0_43 = arith.constant 0 : index
      %82 = vector.load %arg3[%c0_41, %c0_42, %c0_43] : memref<1x16x32xf32, #tpu.memory_space<vmem>>, vector<1x16x32xf32>
      %83 = vector.shape_cast %82 : vector<1x16x32xf32> to vector<16x32xf32>
      %84 = arith.truncf %83 : vector<16x32xf32> to vector<16x32xbf16>
      %c0_44 = arith.constant 0 : index
      %c0_45 = arith.constant 0 : index
      %c0_46 = arith.constant 0 : index
      %85 = vector.load %arg4[%c0_44, %c0_45, %c0_46] : memref<1x16x32xf32, #tpu.memory_space<vmem>>, vector<1x16x32xf32>
      %86 = vector.shape_cast %85 : vector<1x16x32xf32> to vector<16x32xf32>
      %87 = arith.truncf %86 : vector<16x32xf32> to vector<16x32xbf16>
      %c0_47 = arith.constant 0 : index
      %c0_48 = arith.constant 0 : index
      %88 = vector.load %arg8[%c0_47, %c0_48] : memref<32x32xbf16, #tpu.memory_space<vmem>>, vector<32x32xbf16>
      %cst_49 = arith.constant dense<0.000000e+00> : vector<16x32xf32>
      %89 = tpu.matmul %84, %88, %cst_49 {dimension_numbers = #tpu.dot_dimension_numbers<[1], [0], [0], [1], [0, 0, 1, 1], [], []>} : vector<16x32xbf16>, vector<32x32xbf16>, vector<16x32xf32> -> vector<16x32xf32>
      %c0_50 = arith.constant 0 : index
      %c0_51 = arith.constant 0 : index
      %90 = vector.load %arg9[%c0_50, %c0_51] : memref<1x32xf32, #tpu.memory_space<vmem>>, vector<1x32xf32>
      %91 = vector.broadcast %90 : vector<1x32xf32> to vector<16x32xf32>
      %92 = arith.addf %89, %91 : vector<16x32xf32>
      %93 = arith.truncf %92 : vector<16x32xf32> to vector<16x32xbf16>
      %c0_52 = arith.constant 0 : index
      %c0_53 = arith.constant 0 : index
      %94 = vector.load %arg15[%c0_52, %c0_53] : memref<16x32xbf16, #tpu.memory_space<vmem>>, vector<16x32xbf16>
      tpu.vector_store %arg15[%c0_52, %c0_53], %93 {strides = array<i32>} : memref<16x32xbf16, #tpu.memory_space<vmem>>, vector<16x32xbf16>,
      %c0_54 = arith.constant 0 : index
      %c0_55 = arith.constant 0 : index
      %95 = vector.load %arg10[%c0_54, %c0_55] : memref<32x32xbf16, #tpu.memory_space<vmem>>, vector<32x32xbf16>
      %cst_56 = arith.constant dense<0.000000e+00> : vector<16x32xf32>
      %96 = tpu.matmul %87, %95, %cst_56 {dimension_numbers = #tpu.dot_dimension_numbers<[1], [0], [0], [1], [0, 0, 1, 1], [], []>} : vector<16x32xbf16>, vector<32x32xbf16>, vector<16x32xf32> -> vector<16x32xf32>
      %c0_57 = arith.constant 0 : index
      %c0_58 = arith.constant 0 : index
      %97 = vector.load %arg11[%c0_57, %c0_58] : memref<1x32xf32, #tpu.memory_space<vmem>>, vector<1x32xf32>
      %98 = vector.broadcast %97 : vector<1x32xf32> to vector<16x32xf32>
      %99 = arith.addf %96, %98 : vector<16x32xf32>
      %100 = arith.truncf %99 : vector<16x32xf32> to vector<16x32xbf16>
      %c0_59 = arith.constant 0 : index
      %c0_60 = arith.constant 0 : index
      %101 = vector.load %arg16[%c0_59, %c0_60] : memref<16x32xbf16, #tpu.memory_space<vmem>>, vector<16x32xbf16>
      tpu.vector_store %arg16[%c0_59, %c0_60], %100 {strides = array<i32>} : memref<16x32xbf16, #tpu.memory_space<vmem>>, vector<16x32xbf16>,
    } else {
    }
    %c0 = arith.constant 0 : index
    %c0_1 = arith.constant 0 : index
    %c0_2 = arith.constant 0 : index
    %3 = vector.load %arg2[%c0, %c0_1, %c0_2] : memref<1x8x32xf32, #tpu.memory_space<vmem>>, vector<1x8x32xf32>
    %4 = vector.shape_cast %3 : vector<1x8x32xf32> to vector<8x32xf32>
    %5 = arith.truncf %4 : vector<8x32xf32> to vector<8x32xbf16>
    %c0_3 = arith.constant 0 : index
    %c0_4 = arith.constant 0 : index
    %6 = vector.load %arg6[%c0_3, %c0_4] : memref<32x32xbf16, #tpu.memory_space<vmem>>, vector<32x32xbf16>
    %cst = arith.constant dense<0.000000e+00> : vector<8x32xf32>
    %7 = tpu.matmul %5, %6, %cst {dimension_numbers = #tpu.dot_dimension_numbers<[1], [0], [0], [1], [0, 0, 1, 1], [], []>} : vector<8x32xbf16>, vector<32x32xbf16>, vector<8x32xf32> -> vector<8x32xf32>
    %c0_5 = arith.constant 0 : index
    %c0_6 = arith.constant 0 : index
    %8 = vector.load %arg7[%c0_5, %c0_6] : memref<1x32xf32, #tpu.memory_space<vmem>>, vector<1x32xf32>
    %9 = vector.broadcast %8 : vector<1x32xf32> to vector<8x32xf32>
    %10 = arith.addf %7, %9 : vector<8x32xf32>
    %11 = arith.truncf %10 : vector<8x32xf32> to vector<8x32xbf16>
    %c0_7 = arith.constant 0 : index
    %c0_8 = arith.constant 0 : index
    %12 = vector.load %arg15[%c0_7, %c0_8] : memref<16x32xbf16, #tpu.memory_space<vmem>>, vector<16x32xbf16>
    %c0_9 = arith.constant 0 : index
    %c0_10 = arith.constant 0 : index
    %13 = vector.load %arg16[%c0_9, %c0_10] : memref<16x32xbf16, #tpu.memory_space<vmem>>, vector<16x32xbf16>
    %c0_11 = arith.constant 0 : index
    %c0_12 = arith.constant 0 : index
    %14 = vector.load %arg5[%c0_11, %c0_12] : memref<8x16xf32, #tpu.memory_space<vmem>>, vector<8x16xf32>
    %cst_13 = arith.constant 0.000000e+00 : f32
    %15 = vector.broadcast %cst_13 : f32 to vector<8x16xf32>
    %16 = arith.cmpf oeq, %14, %15 : vector<8x16xf32>
    %17 = vector.extract_strided_slice %11 {offsets = [0, 0], sizes = [8, 8], strides = [1, 1]} : vector<8x32xbf16> to vector<8x8xbf16>
    %18 = vector.extract_strided_slice %12 {offsets = [0, 0], sizes = [16, 8], strides = [1, 1]} : vector<16x32xbf16> to vector<16x8xbf16>
    %cst_14 = arith.constant dense<0.000000e+00> : vector<8x16xf32>
    %19 = tpu.matmul %17, %18, %cst_14 {dimension_numbers = #tpu.dot_dimension_numbers<[1], [1], [0], [0], [0, 0, 1, 0], [], []>} : vector<8x8xbf16>, vector<16x8xbf16>, vector<8x16xf32> -> vector<8x16xf32>
    %cst_15 = arith.constant -1.000000e+09 : f32
    %20 = vector.broadcast %cst_15 : f32 to vector<8x16xf32>
    %21 = arith.select %16, %20, %19 : vector<8x16xi1>, vector<8x16xf32>
    %22 = vector.extract_strided_slice %11 {offsets = [0, 8], sizes = [8, 8], strides = [1, 1]} : vector<8x32xbf16> to vector<8x8xbf16>
    %23 = vector.extract_strided_slice %12 {offsets = [0, 8], sizes = [16, 8], strides = [1, 1]} : vector<16x32xbf16> to vector<16x8xbf16>
    %cst_16 = arith.constant dense<0.000000e+00> : vector<8x16xf32>
    %24 = tpu.matmul %22, %23, %cst_16 {dimension_numbers = #tpu.dot_dimension_numbers<[1], [1], [0], [0], [0, 0, 1, 0], [], []>} : vector<8x8xbf16>, vector<16x8xbf16>, vector<8x16xf32> -> vector<8x16xf32>
    %cst_17 = arith.constant -1.000000e+09 : f32
    %25 = vector.broadcast %cst_17 : f32 to vector<8x16xf32>
    %26 = arith.select %16, %25, %24 : vector<8x16xi1>, vector<8x16xf32>
    %27 = vector.extract_strided_slice %11 {offsets = [0, 16], sizes = [8, 8], strides = [1, 1]} : vector<8x32xbf16> to vector<8x8xbf16>
    %28 = vector.extract_strided_slice %12 {offsets = [0, 16], sizes = [16, 8], strides = [1, 1]} : vector<16x32xbf16> to vector<16x8xbf16>
    %cst_18 = arith.constant dense<0.000000e+00> : vector<8x16xf32>
    %29 = tpu.matmul %27, %28, %cst_18 {dimension_numbers = #tpu.dot_dimension_numbers<[1], [1], [0], [0], [0, 0, 1, 0], [], []>} : vector<8x8xbf16>, vector<16x8xbf16>, vector<8x16xf32> -> vector<8x16xf32>
    %cst_19 = arith.constant -1.000000e+09 : f32
    %30 = vector.broadcast %cst_19 : f32 to vector<8x16xf32>
    %31 = arith.select %16, %30, %29 : vector<8x16xi1>, vector<8x16xf32>
    %32 = vector.extract_strided_slice %11 {offsets = [0, 24], sizes = [8, 8], strides = [1, 1]} : vector<8x32xbf16> to vector<8x8xbf16>
    %33 = vector.extract_strided_slice %12 {offsets = [0, 24], sizes = [16, 8], strides = [1, 1]} : vector<16x32xbf16> to vector<16x8xbf16>
    %cst_20 = arith.constant dense<0.000000e+00> : vector<8x16xf32>
    %34 = tpu.matmul %32, %33, %cst_20 {dimension_numbers = #tpu.dot_dimension_numbers<[1], [1], [0], [0], [0, 0, 1, 0], [], []>} : vector<8x8xbf16>, vector<16x8xbf16>, vector<8x16xf32> -> vector<8x16xf32>
    %cst_21 = arith.constant -1.000000e+09 : f32
    %35 = vector.broadcast %cst_21 : f32 to vector<8x16xf32>
    %36 = arith.select %16, %35, %34 : vector<8x16xi1>, vector<8x16xf32>
    %37 = arith.maximumf %21, %26 : vector<8x16xf32>
    %38 = arith.maximumf %37, %31 : vector<8x16xf32>
    %39 = arith.maximumf %38, %36 : vector<8x16xf32>
    %40 = arith.subf %21, %39 : vector<8x16xf32>
    %41 = math.exp %40 : vector<8x16xf32>
    %42 = arith.subf %26, %39 : vector<8x16xf32>
    %43 = math.exp %42 : vector<8x16xf32>
    %44 = arith.subf %31, %39 : vector<8x16xf32>
    %45 = math.exp %44 : vector<8x16xf32>
    %46 = arith.subf %36, %39 : vector<8x16xf32>
    %47 = math.exp %46 : vector<8x16xf32>
    %48 = arith.addf %41, %43 : vector<8x16xf32>
    %49 = arith.addf %48, %45 : vector<8x16xf32>
    %50 = arith.addf %49, %47 : vector<8x16xf32>
    %51 = tpu.reciprocal %50 {approx = true} : vector<8x16xf32> -> vector<8x16xf32>
    %52 = arith.mulf %41, %51 : vector<8x16xf32>
    %53 = arith.truncf %52 : vector<8x16xf32> to vector<8x16xbf16>
    %54 = vector.extract_strided_slice %13 {offsets = [0, 0], sizes = [16, 8], strides = [1, 1]} : vector<16x32xbf16> to vector<16x8xbf16>
    %cst_22 = arith.constant dense<0.000000e+00> : vector<8x8xf32>
    %55 = tpu.matmul %53, %54, %cst_22 {dimension_numbers = #tpu.dot_dimension_numbers<[1], [0], [0], [1], [0, 0, 1, 1], [], []>} : vector<8x16xbf16>, vector<16x8xbf16>, vector<8x8xf32> -> vector<8x8xf32>
    %c0_23 = arith.constant 0 : index
    %c0_24 = arith.constant 0 : index
    %56 = vector.load %arg17[%c0_23, %c0_24] : memref<8x32xf32, #tpu.memory_space<vmem>>, vector<8x8xf32>
    tpu.vector_store %arg17[%c0_23, %c0_24], %55 {strides = array<i32>} : memref<8x32xf32, #tpu.memory_space<vmem>>, vector<8x8xf32>,
    %57 = arith.mulf %43, %51 : vector<8x16xf32>
    %58 = arith.truncf %57 : vector<8x16xf32> to vector<8x16xbf16>
    %59 = vector.extract_strided_slice %13 {offsets = [0, 8], sizes = [16, 8], strides = [1, 1]} : vector<16x32xbf16> to vector<16x8xbf16>
    %cst_25 = arith.constant dense<0.000000e+00> : vector<8x8xf32>
    %60 = tpu.matmul %58, %59, %cst_25 {dimension_numbers = #tpu.dot_dimension_numbers<[1], [0], [0], [1], [0, 0, 1, 1], [], []>} : vector<8x16xbf16>, vector<16x8xbf16>, vector<8x8xf32> -> vector<8x8xf32>
    %c0_26 = arith.constant 0 : index
    %c8 = arith.constant 8 : index
    %61 = vector.load %arg17[%c0_26, %c8] : memref<8x32xf32, #tpu.memory_space<vmem>>, vector<8x8xf32>
    tpu.vector_store %arg17[%c0_26, %c8], %60 {strides = array<i32>} : memref<8x32xf32, #tpu.memory_space<vmem>>, vector<8x8xf32>,
    %62 = arith.mulf %45, %51 : vector<8x16xf32>
    %63 = arith.truncf %62 : vector<8x16xf32> to vector<8x16xbf16>
    %64 = vector.extract_strided_slice %13 {offsets = [0, 16], sizes = [16, 8], strides = [1, 1]} : vector<16x32xbf16> to vector<16x8xbf16>
    %cst_27 = arith.constant dense<0.000000e+00> : vector<8x8xf32>
    %65 = tpu.matmul %63, %64, %cst_27 {dimension_numbers = #tpu.dot_dimension_numbers<[1], [0], [0], [1], [0, 0, 1, 1], [], []>} : vector<8x16xbf16>, vector<16x8xbf16>, vector<8x8xf32> -> vector<8x8xf32>
    %c0_28 = arith.constant 0 : index
    %c16 = arith.constant 16 : index
    %66 = vector.load %arg17[%c0_28, %c16] : memref<8x32xf32, #tpu.memory_space<vmem>>, vector<8x8xf32>
    tpu.vector_store %arg17[%c0_28, %c16], %65 {strides = array<i32>} : memref<8x32xf32, #tpu.memory_space<vmem>>, vector<8x8xf32>,
    %67 = arith.mulf %47, %51 : vector<8x16xf32>
    %68 = arith.truncf %67 : vector<8x16xf32> to vector<8x16xbf16>
    %69 = vector.extract_strided_slice %13 {offsets = [0, 24], sizes = [16, 8], strides = [1, 1]} : vector<16x32xbf16> to vector<16x8xbf16>
    %cst_29 = arith.constant dense<0.000000e+00> : vector<8x8xf32>
    %70 = tpu.matmul %68, %69, %cst_29 {dimension_numbers = #tpu.dot_dimension_numbers<[1], [0], [0], [1], [0, 0, 1, 1], [], []>} : vector<8x16xbf16>, vector<16x8xbf16>, vector<8x8xf32> -> vector<8x8xf32>
    %c0_30 = arith.constant 0 : index
    %c24 = arith.constant 24 : index
    %71 = vector.load %arg17[%c0_30, %c24] : memref<8x32xf32, #tpu.memory_space<vmem>>, vector<8x8xf32>
    tpu.vector_store %arg17[%c0_30, %c24], %70 {strides = array<i32>} : memref<8x32xf32, #tpu.memory_space<vmem>>, vector<8x8xf32>,
    %c0_31 = arith.constant 0 : index
    %c0_32 = arith.constant 0 : index
    %72 = vector.load %arg17[%c0_31, %c0_32] : memref<8x32xf32, #tpu.memory_space<vmem>>, vector<8x32xf32>
    %73 = arith.truncf %72 : vector<8x32xf32> to vector<8x32xbf16>
    %c0_33 = arith.constant 0 : index
    %c0_34 = arith.constant 0 : index
    %74 = vector.load %arg12[%c0_33, %c0_34] : memref<32x32xbf16, #tpu.memory_space<vmem>>, vector<32x32xbf16>
    %cst_35 = arith.constant dense<0.000000e+00> : vector<8x32xf32>
    %75 = tpu.matmul %73, %74, %cst_35 {dimension_numbers = #tpu.dot_dimension_numbers<[1], [0], [0], [1], [0, 0, 1, 1], [], []>} : vector<8x32xbf16>, vector<32x32xbf16>, vector<8x32xf32> -> vector<8x32xf32>
    %c0_36 = arith.constant 0 : index
    %c0_37 = arith.constant 0 : index
    %76 = vector.load %arg13[%c0_36, %c0_37] : memref<1x32xf32, #tpu.memory_space<vmem>>, vector<1x32xf32>
    %77 = vector.broadcast %76 : vector<1x32xf32> to vector<8x32xf32>
    %78 = arith.addf %75, %77 : vector<8x32xf32>
    %c0_38 = arith.constant 0 : index
    %c0_39 = arith.constant 0 : index
    %c0_40 = arith.constant 0 : index
    %79 = vector.load %arg14[%c0_38, %c0_39, %c0_40] : memref<1x8x32xf32, #tpu.memory_space<vmem>>, vector<1x8x32xf32>
    %80 = vector.shape_cast %79 : vector<1x8x32xf32> to vector<8x32xf32>
    %81 = vector.shape_cast %78 : vector<8x32xf32> to vector<1x8x32xf32>
    tpu.vector_store %arg14[%c0_38, %c0_39, %c0_40], %81 {strides = array<i32>} : memref<1x8x32xf32, #tpu.memory_space<vmem>>, vector<1x8x32xf32>,
    return
  }
  func.func @transform_0(%arg0: i32, %arg1: i32) -> (i32, i32, i32) {
    %c0_i32 = arith.constant 0 : i32
    %c0_i32_0 = arith.constant 0 : i32
    return %arg0, %arg1, %c0_i32 : i32, i32, i32
  }
  func.func @transform_1(%arg0: i32, %arg1: i32) -> (i32, i32, i32) {
    %c0_i32 = arith.constant 0 : i32
    %c0_i32_0 = arith.constant 0 : i32
    %c0_i32_1 = arith.constant 0 : i32
    return %arg0, %c0_i32, %c0_i32_0 : i32, i32, i32
  }
  func.func @transform_2(%arg0: i32, %arg1: i32) -> (i32, i32, i32) {
    %c0_i32 = arith.constant 0 : i32
    %c0_i32_0 = arith.constant 0 : i32
    %c0_i32_1 = arith.constant 0 : i32
    return %arg0, %c0_i32, %c0_i32_0 : i32, i32, i32
  }
  func.func @transform_3(%arg0: i32, %arg1: i32) -> (i32, i32) {
    %c0_i32 = arith.constant 0 : i32
    %c0_i32_0 = arith.constant 0 : i32
    return %arg1, %c0_i32 : i32, i32
  }
  func.func @transform_4(%arg0: i32, %arg1: i32) -> (i32, i32) {
    %c0_i32 = arith.constant 0 : i32
    %c0_i32_0 = arith.constant 0 : i32
    %c0_i32_1 = arith.constant 0 : i32
    return %c0_i32, %c0_i32_0 : i32, i32
  }
  func.func @transform_5(%arg0: i32, %arg1: i32) -> (i32, i32) {
    %c0_i32 = arith.constant 0 : i32
    %c0_i32_0 = arith.constant 0 : i32
    %c0_i32_1 = arith.constant 0 : i32
    return %c0_i32, %c0_i32_0 : i32, i32
  }
  func.func @transform_6(%arg0: i32, %arg1: i32) -> (i32, i32) {
    %c0_i32 = arith.constant 0 : i32
    %c0_i32_0 = arith.constant 0 : i32
    %c0_i32_1 = arith.constant 0 : i32
    return %c0_i32, %c0_i32_0 : i32, i32
  }
  func.func @transform_7(%arg0: i32, %arg1: i32) -> (i32, i32) {
    %c0_i32 = arith.constant 0 : i32
    %c0_i32_0 = arith.constant 0 : i32
    %c0_i32_1 = arith.constant 0 : i32
    return %c0_i32, %c0_i32_0 : i32, i32
  }
  func.func @transform_8(%arg0: i32, %arg1: i32) -> (i32, i32) {
    %c0_i32 = arith.constant 0 : i32
    %c0_i32_0 = arith.constant 0 : i32
    %c0_i32_1 = arith.constant 0 : i32
    return %c0_i32, %c0_i32_0 : i32, i32
  }
  func.func @transform_9(%arg0: i32, %arg1: i32) -> (i32, i32) {
    %c0_i32 = arith.constant 0 : i32
    %c0_i32_0 = arith.constant 0 : i32
    %c0_i32_1 = arith.constant 0 : i32
    return %c0_i32, %c0_i32_0 : i32, i32
  }
  func.func @transform_10(%arg0: i32, %arg1: i32) -> (i32, i32) {
    %c0_i32 = arith.constant 0 : i32
    %c0_i32_0 = arith.constant 0 : i32
    %c0_i32_1 = arith.constant 0 : i32
    return %c0_i32, %c0_i32_0 : i32, i32
  }
  func.func @transform_11(%arg0: i32, %arg1: i32) -> (i32, i32) {
    %c0_i32 = arith.constant 0 : i32
    %c0_i32_0 = arith.constant 0 : i32
    %c0_i32_1 = arith.constant 0 : i32
    return %c0_i32, %c0_i32_0 : i32, i32
  }
  func.func @transform_12(%arg0: i32, %arg1: i32) -> (i32, i32, i32) {
    %c0_i32 = arith.constant 0 : i32
    %c0_i32_0 = arith.constant 0 : i32
    return %arg0, %arg1, %c0_i32 : i32, i32, i32
  }
}

</mosaic_0001>

<bundles_post_ra>
// kernel: tpu_custom_call.1
= control target key start
LH: loop header
LB: loop body
LE: loop exit
PB: predicated region body
PF: predicated region fallthrough
CT: control target
= control target key end

     0   :  { %s2978_s0 = inlined_call_operand.hbm [shape: f32[2,16,32], index: 0, kind: input, shape index: {}]   ;;  %s2979_s1 = inlined_call_operand.hbm [shape: f32[2,16,32], index: 1, kind: input, shape index: {}]   ;;  %s2980_s2 = inlined_call_operand.hbm [shape: f32[2,16,32], index: 2, kind: input, shape index: {}]   ;;  %s2981_s3 = inlined_call_operand.hbm [shape: f32[16,16], index: 3, kind: input, shape index: {}]   ;;  %s2982_s4 = inlined_call_operand.hbm [shape: bf16[32,32], index: 4, kind: input, shape index: {}]   ;;  %s2983_s5 = inlined_call_operand.vmem [shape: f32[1,32], index: 5, kind: input, shape index: {}]   ;;  %s2984_s6 = inlined_call_operand.vmem [shape: bf16[32,32], index: 6, kind: input, shape index: {}]   ;;  %s2985_s7 = inlined_call_operand.vmem [shape: f32[1,32], index: 7, kind: input, shape index: {}]   ;;  %s2986_s8 = inlined_call_operand.hbm [shape: bf16[32,32], index: 8, kind: input, shape index: {}]   ;;  %s2987_s9 = inlined_call_operand.hbm [shape: f32[1,32], index: 9, kind: input, shape index: {}]   ;;  %s2988_s10 = inlined_call_operand.vmem [shape: bf16[32,32], index: 10, kind: input, shape index: {}]   ;;  %s2989_s11 = inlined_call_operand.vmem [shape: f32[1,32], index: 11, kind: input, shape index: {}]   ;;  %s2990_s12 = inlined_call_operand.hbm [shape: f32[2,16,32], index: 12, kind: output, shape index: {}]  }
   0x1   :  { %3022 = sst [smem:[#allocation37_spill]] %s2978_s0 }
   0x2   :  { %3023 = sst [smem:[#allocation38_spill]] %s2979_s1 }
   0x3   :  { %3024 = sst [smem:[#allocation39_spill]] %s2981_s3 }
   0x4   :  { %3025 = sst [smem:[#allocation40_spill]] %s2982_s4 }
   0x5   :  { %3026 = sst [smem:[#allocation41_spill]] %s2983_s5 }
   0x6   :  { %3027 = sst [smem:[#allocation42_spill]] %s2984_s6 }
   0x7   :  { %3028 = sst [smem:[#allocation43_spill]] %s2985_s7 }
   0x8   :  { %3029 = sst [smem:[#allocation44_spill]] %s2986_s8 }
   0x9   :  { %3030 = sst [smem:[#allocation45_spill]] %s2987_s9 }
   0xa   :  { %3031 = sst [smem:[#allocation46_spill]] %s2988_s10 }
   0xb   :  { %3032 = sst [smem:[#allocation47_spill]] %s2989_s11 }
   0xc   :  { %3033 = sst [smem:[#allocation48_spill]] %s2990_s12 }
   0xd   :  { %17 = vsyncpa [#allocation6], 0 }
   0xe   :  { %19 = vsyncpa [#allocation6 + $0x1], 0 }
   0xf   :  { %20 = vsyncpa [#allocation9], 0 }
  0x10   :  { %22 = vsyncpa [#allocation9 + $0x1], 0 }
  0x11   :  { %23 = vsyncpa [#allocation12], 0 }
  0x12   :  { %25 = vsyncpa [#allocation12 + $0x1], 0 }
  0x13   :  { %26 = vsyncpa [#allocation15], 0 }
  0x14   :  { %27 = vsyncpa [#allocation7], 0 }
  0x15   :  { %29 = vsyncpa [#allocation7 + $0x1], 0  ;;  %s2348_s21 = smov 0   ;;  %s2350_s22 = smov 0  }
  0x16   :  { %s2352_s23 = smov 0   ;;  %s2354_s24 = smov 0  }
  0x17   :  { %s2356_s25 = smov 0   ;;  %s2358_s26 = smov 0  }
  0x18   :  { %s2360_s27 = smov 0   ;;  %s2362_s28 = smov 0  }
  0x19   :  { %s2364_s29 = smov 0   ;;  %s2366_s30 = smov 0  }
  0x1a   :  { %s2368_s13 = smov 0   ;;  %s2370_s14 = smov 0  }
  0x1b   :  { %s2372_s15 = smov 0   ;;  %s2374_s16 = smov 0  }
  0x1c LB: > { %3034 = sst [smem:[#allocation24_spill]] %s2207_s21  ;;  %s2419_s17 = sadd.s32 4294967295, %s2259_s16   ;;  %s2259_s16 = sphi %s2374_s16, %s35_s16   ;;  %s2255_s15 = sphi %s2372_s15, %s3127_s15   ;;  %s2251_s14 = sphi %s2370_s14, %s3126_s14   ;;  %s2247_s13 = sphi %s2368_s13, %s3125_s13   ;;  %s2243_s30 = sphi %s2366_s30, %s3124_s30   ;;  %s2239_s29 = sphi %s2364_s29, %s3123_s29   ;;  %s2235_s28 = sphi %s2362_s28, %s3122_s28   ;;  %s2231_s27 = sphi %s2360_s27, %s3121_s27   ;;  %s2227_s26 = sphi %s2358_s26, %s3120_s26   ;;  %s2223_s25 = sphi %s2356_s25, %s3119_s25   ;;  %s2219_s24 = sphi %s2354_s24, %s3115_s24   ;;  %s2215_s23 = sphi %s2352_s23, %s3118_s23   ;;  %s2211_s22 = sphi %s2350_s22, %s3114_s22   ;;  %s2207_s21 = sphi %s2348_s21, %s3113_s21  }
  0x1d   : > { %3035 = sst [smem:[#allocation25_spill]] %s2211_s22  ;;  %p1524_p0 = scmp.ge.s32.totalorder %s2259_s16, 1 }
  0x1e   : > { %3036 = sst [smem:[#allocation26_spill]] %s2215_s23  ;;  %p2995_p1 = scmp.eq.s32.totalorder %s2419_s17, 0 }
  0x1f   : > { %3037 = sst [smem:[#allocation27_spill]] %s2223_s25  ;;  %p354_p2 = scmp.lt.s32.totalorder %s2259_s16, 5 }
  0x20   : > { %3038 = sst [smem:[#allocation28_spill]] %s2231_s27  ;;  %s2261_s19 = smov [#allocation13]  }
  0x21   : > { %3039 = sst [smem:[#allocation29_spill]] %s2243_s30  ;;  %p2424_p3 = pnand %p1524_p0, %p354_p2 }
  0x22   : > { %3040 = sst [smem:[#allocation30_spill]] %s2247_s13  ;;  %s366_s20 = sshll.u32 %s2261_s19, 4  ;;  %s367_s20 = int_to_ptr.vmem [resolvable:$true] %s366_s20 }
  0x23   : > { %s3041_s18 = scalar_select %p2424_p3, 1, 0 }
  0x24   : > { %p1711_p4 = pneg %p2424_p3  ;;  %s2262_s11 = smov [#allocation14]  }
  0x25   : > { %3042 = sst [smem:[#allocation31_spill]] %s3041_s18  ;;  %s388_s13 = sshll.u32 %s2262_s11, 4  ;;  %s2436_s13 = int_to_ptr.vmem [resolvable:$true] %s388_s13 }
  0x26   : > { %p2432_p5 = pnand %p1711_p4, %p2995_p1  ;;  %s3044_s4 = sld [smem:[#allocation40_spill]] }
  0x28   : > { %s3043_s12 = scalar_select %p2432_p5, 1, 0 }
  0x29   : > { %p2446_p7 = pneg %p2432_p5 }
  0x2c   : > { %s1893_s7 = scalar_lea.hbm %s3044_s4, 256 }
  0x2d   : > { %p1894_p6 = scmp.ne.s32.totalorder %s3044_s4, %s1893_s7  ;;  %p1900_p10 = scmp.lt.u32.totalorder %s1893_s7, %s3044_s4 }
  0x2f   : > { %p1896_p8 = pnand %p2446_p7, %p1894_p6 }
  0x31   : > { %p1897_p9 = pneg %p1896_p8 }
  0x33   : > { %p1902_p11 = pnand %p1900_p10, %p1897_p9 }
  0x35   : > { %1905 = shalt.err (!%p1902_p11)
}
  0x36   : > { %s1906_s5 = scalar_lea.vmem %s367_s20, 256  ;;  %p1914_p2 = scmp.lt.s32.totalorder %s367_s20, %s367_s20 }
  0x37   : > { %p1907_p12 = scmp.ne.s32.totalorder %s367_s20, %s1906_s5  ;;  %p1915_p4 = scmp.lt.s32.totalorder %s1906_s5, %s1906_s5 }
  0x39   : > { %p1909_p13 = pnand %p1907_p12, %p2446_p7  ;;  %p1916_p1 = por %p1915_p4, %p1914_p2 }
  0x3b   : > { %p1910_p0 = pneg %p1909_p13 }
  0x3d   : > { %p1917_p3 = pnand %p1916_p1, %p1910_p0 }
  0x3f   : > { %1920 = shalt.err (!%p1917_p3)
}
  0x40   : > { %s2263_s6 = smov 64   ;;  %s2264_s10 = smov 4  }
  0x41   : > { %1714 = dma.hbm_to_vmem [thread:$0]  (!%p2432_p5), %s3044_s4, 256, %s367_s20, [#allocation12], %s2263_s6, %s2263_s6, %s2264_s10  }
  0x42   : > { %s3046_s8 = sld [smem:[#allocation44_spill]] }
  0x48   : > { %s1921_s3 = scalar_lea.hbm %s3046_s8, 256 }
  0x49   : > { %p1922_p6 = scmp.ne.s32.totalorder %s3046_s8, %s1921_s3  ;;  %p1928_p8 = scmp.lt.u32.totalorder %s1921_s3, %s3046_s8 }
  0x4b   : > { %p1924_p1 = pnand %p1922_p6, %p2446_p7 }
  0x4d   : > { %p1925_p3 = pneg %p1924_p1 }
  0x4f   : > { %p1930_p9 = pnand %p1928_p8, %p1925_p3 }
  0x51   : > { %1933 = shalt.err (!%p1930_p9)
}
  0x52   : > { %s1934_s20 = scalar_lea.vmem %s2436_s13, 256  ;;  %p1942_p13 = scmp.lt.s32.totalorder %s2436_s13, %s2436_s13 }
  0x53   : > { %p1935_p10 = scmp.ne.s32.totalorder %s2436_s13, %s1934_s20  ;;  %p1943_p0 = scmp.lt.s32.totalorder %s1934_s20, %s1934_s20 }
  0x55   : > { %p1937_p11 = pnand %p1935_p10, %p2446_p7  ;;  %p1944_p2 = por %p1943_p0, %p1942_p13 }
  0x57   : > { %p1938_p12 = pneg %p1937_p11 }
  0x59   : > { %p1945_p4 = pnand %p1944_p2, %p1938_p12 }
  0x5b   : > { %1948 = shalt.err (!%p1945_p4)
}
  0x5c   : > { %1717 = dma.hbm_to_vmem [thread:$0]  (!%p2432_p5), %s3046_s8, 256, %s2436_s13, [#allocation15], %s2263_s6, %s2263_s6, %s2264_s10  }
  0x5d   : > { %p3001_p6 = scmp.eq.s32.totalorder %s2259_s16, 0  ;;  %p89_p1 = scmp.ne.s32.totalorder %s2227_s26, %s2223_s25 }
  0x5e   : > { %p95_p3 = scmp.ne.s32.totalorder %s2223_s25, %s2219_s24  ;;  %p3000_p8 = scmp.lt.s32.totalorder %s2259_s16, 4 }
  0x5f   : > { %s3002_s23 = sand.u32 1, %s2259_s16   ;;  %p91_p9 = por %p89_p1, %p3001_p6 }
  0x60   : > { %p3047_p10 = scmp.eq.s32.totalorder %s2419_s17, 0  ;;  %s441_s7 = sand.u32 1, %s2227_s26  }
  0x61   : > { %s2502_s18 = sshll.u32 %s441_s7, 4  ;;  %s1579_s11 = sshll.u32 %s2255_s15, 8 }
  0x62   : > { %p2497_p11 = por %p95_p3, %p3047_p10  ;;  %s3050_s1 = sld [smem:[#allocation38_spill]] }
  0x63   : > { %s443_s24 = scalar_lea.vmem [#allocation8], %s2502_s18  ;;  %p2515_p12 = pnand %p3000_p8, %p91_p9 }
  0x64   : > { %s3048_s30 = scalar_select %p2497_p11, 1, 0 }
  0x65   : > { %s450_s5 = sshll.u32 %s443_s24, 4  ;;  %s2523_s3 = scalar_lea.sflag [#allocation9], %s3002_s23  ;;  %s2519_s5 = int_to_ptr.vmem [resolvable:$true] %s450_s5 }
  0x66   : > { %3049 = sst [smem:[#allocation32_spill]] %s3048_s30  ;;  %p3011_p0 = pneg %p2515_p12 }
  0x67   : > { %s3051_s20 = scalar_select %p2515_p12, 1, 0 }
  0x68   : > { %s2510_s10 = scalar_lea.hbm %s3050_s1, %s1579_s11  ;;  %s1954_s6 = scalar_lea.hbm %s3050_s1, 512 }
  0x69   : > { %3052 = sst [smem:[#allocation33_spill]] %s3051_s20  ;;  %s1949_s21 = scalar_lea.hbm %s2510_s10, 256 }
  0x6a   : > { %p1950_p13 = scmp.ne.s32.totalorder %s2510_s10, %s1949_s21  ;;  %p1955_p1 = scmp.lt.u32.totalorder %s2510_s10, %s3050_s1 }
  0x6b   : > { %p1956_p3 = scmp.lt.u32.totalorder %s1954_s6, %s1949_s21  ;;  %p1958_p10 = scmp.lt.u32.totalorder %s1949_s21, %s2510_s10 }
  0x6c   : > { %p1952_p2 = pnand %p3011_p0, %p1950_p13 }
  0x6d   : > { %p1957_p9 = por %p1956_p3, %p1955_p1 }
  0x6e   : > { %p1953_p4 = pneg %p1952_p2 }
  0x6f   : > { %p1959_p8 = por %p1958_p10, %p1957_p9 }
  0x71   : > { %p1960_p6 = pnand %p1959_p8, %p1953_p4 }
  0x73   : > { %1963 = shalt.err (!%p1960_p6)
}
  0x74   : > { %s1964_s23 = scalar_lea.vmem %s2519_s5, 256  ;;  %s2265_s7 = smov [#allocation8]  }
  0x75   : > { %p1965_p13 = scmp.ne.s32.totalorder %s2519_s5, %s1964_s23  ;;  %s1969_s13 = sshll.u32 %s2265_s7, 4  ;;  %s1970_s13 = int_to_ptr.vmem [resolvable:$false] %s1969_s13 }
  0x76   : > { %s1971_s22 = scalar_lea.vmem %s1970_s13, 512  ;;  %p1972_p5 = scmp.lt.s32.totalorder %s2519_s5, %s1970_s13 }
  0x77   : > { %p1967_p2 = pnand %p1965_p13, %p3011_p0  ;;  %p1973_p1 = scmp.lt.s32.totalorder %s1971_s22, %s1964_s23 }
  0x79   : > { %p1968_p11 = pneg %p1967_p2  ;;  %p1974_p3 = por %p1973_p1, %p1972_p5 }
  0x7b   : > { %p1975_p9 = pnand %p1974_p3, %p1968_p11 }
  0x7d   : > { %1978 = shalt.err (!%p1975_p9)
}
  0x7e   : > { %s3012_s21 = smov 128   ;;  %s3013_s6 = smov 8  }
  0x7f   : > { %1727 = dma.hbm_to_vmem [thread:$0]  (!%p2515_p12), %s2510_s10, 256, %s2519_s5, %s2523_s3, %s3012_s21, %s3012_s21, %s3013_s6  }
  0x80   : > { %s2559_s7 = scalar_lea.hbm %s2980_s2, %s1579_s11  ;;  %s464_s13 = scalar_lea.vmem [#allocation10], %s2502_s18 }
  0x81   : > { %s471_s22 = sshll.u32 %s464_s13, 4  ;;  %s2268_s1 = smov [#allocation16]   ;;  %s2562_s22 = int_to_ptr.vmem [resolvable:$true] %s471_s22 }
  0x82   : > { %s402_s4 = sshll.u32 %s2268_s1, 4  ;;  %s3053_s9 = sld [smem:[#allocation45_spill]]  ;;  %s403_s4 = int_to_ptr.vmem [resolvable:$true] %s402_s4 }
  0x88   : > { %s1979_s25 = scalar_lea.hbm %s3053_s9, 16 }
  0x89   : > { %p1980_p5 = scmp.ne.s32.totalorder %s3053_s9, %s1979_s25  ;;  %p1986_p11 = scmp.lt.u32.totalorder %s1979_s25, %s3053_s9 }
  0x8b   : > { %p1982_p6 = pnand %p1980_p5, %p2446_p7 }
  0x8d   : > { %p1983_p8 = pneg %p1982_p6 }
  0x8f   : > { %p1988_p4 = pnand %p1986_p11, %p1983_p8 }
  0x91   : > { %1991 = shalt.err (!%p1988_p4)
}
  0x92   : > { %s1992_s18 = scalar_lea.vmem %s403_s4, 16  ;;  %s1999_s1 = scalar_lea.vmem %s403_s4, 32 }
  0x93   : > { %p1993_p10 = scmp.ne.s32.totalorder %s403_s4, %s1992_s18  ;;  %p2000_p1 = scmp.lt.s32.totalorder %s403_s4, %s403_s4 }
  0x94   : > { %p2001_p3 = scmp.lt.s32.totalorder %s1999_s1, %s1992_s18 }
  0x95   : > { %p1995_p13 = pnand %p1993_p10, %p2446_p7 }
  0x96   : > { %p2002_p9 = por %p2001_p3, %p2000_p1 }
  0x97   : > { %p1996_p2 = pneg %p1995_p13 }
  0x99   : > { %p2003_p0 = pnand %p2002_p9, %p1996_p2 }
  0x9b   : > { %2006 = shalt.err (!%p2003_p0)
}
  0x9c   : > { %p3054_p5 = scmp.ne.s32.totalorder %s3043_s12, 0  ;;  %s1523_s12 = sadd.s32 4294967294, %s2259_s16  }
  0x9d   : > { %s44_s25 = sadd.s32 1, %s2251_s14  ;;  %s47_s19 = sadd.s32 1, %s2255_s15 }
  0x9e   : > { %1720 = dma.hbm_to_vmem [thread:$0]  (!%p3054_p5), %s3053_s9, 16, %s403_s4, [#allocation15]  }
  0x9f   : > { %p45_p7 = scmp.ge.s32.totalorder %s44_s25, 2  ;;  %s56_s30 = sadd.s32 1, %s2239_s29 }
  0xa0   : > { %p63_p0 = scmp.ne.s32.totalorder %s2239_s29, %s2235_s28  ;;  %p69_p6 = scmp.ne.s32.totalorder %s2235_s28, %s2231_s27 }
  0xa1   : > { %s3129_s25 = smov (%p45_p7, %s44_s25), 0  ;;  %s3131_s19 = smov (!%p45_p7, %s47_s19), %s2255_s15 }
  0xa2   : > { %3055 = sst [smem:[#allocation34_spill]] %s3129_s25  ;;  %s2595_s5 = ssub.s32 %s2251_s14, %s3129_s25 }
  0xa3   : > { %p3056_p8 = scmp.eq.s32.totalorder %s2259_s16, 0  ;;  %p49_p4 = scmp.ge.s32.totalorder %s3131_s19, 2 }
  0xa4   : > { %p3058_p10 = scmp.eq.s32.totalorder %s2419_s17, 0  ;;  %p341_p1 = scmp.eq.s32.totalorder %s2419_s17, 3 }
  0xa5   : > { %p2599_p11 = por %p3056_p8, %p63_p0  ;;  %s3133_s19 = smov (%p49_p4, %s3131_s19), 0 }
  0xa6   : > { %p2608_p13 = por %p3058_p10, %p69_p6  ;;  %3061 = sst [smem:[#allocation36_spill]] %s3133_s19 }
  0xa7   : > { %p2616_p3 = por %p341_p1, %p63_p0  ;;  %p347_p9 = scmp.eq.s32.totalorder %s1523_s12, 3 }
  0xa8   : > { %s3059_s20 = scalar_select %p2608_p13, 1, 0 }
  0xa9   : > { %s3062_s24 = scalar_select %p2616_p3, 1, 0 }
  0xaa   : > { %3060 = sst [smem:[#allocation35_spill]] %s3059_s20  ;;  %s51_s23 = ssub.s32 %s2255_s15, %s3133_s19 }
  0xab   : > { %s419_s13 = sand.u32 1, %s2239_s29   ;;  %s53_s11 = sor.u32 %s2595_s5, %s51_s23 }
  0xac   : > { %p80_p5 = scmp.eq.s32.totalorder %s51_s23, 0  ;;  %p54_p7 = scmp.eq.s32.totalorder %s53_s11, 0 }
  0xad   : > { %p2627_p8 = por %p347_p9, %p69_p6  ;;  %s3066_s1 = sadd.s32 1, %s2227_s26 }
  0xae   : > { %s2634_s0 = scalar_select %p80_p5, %s2227_s26, %s3066_s1  }
  0xaf   : > { %s3064_s18 = scalar_select %p2627_p8, 1, 0 }
  0xb0   : > { %s2637_s8 = scalar_select %p54_p7, %s2239_s29, %s56_s30  }
  0xb1   : > { %3065 = sst [smem:[#allocation33_spill]] %s3064_s18  ;;  %s1529_s12 = sshll.u32 %s419_s13, 3 }
  0xb2   : > { %s1530_s21 = sshll.u32 %s2255_s15, 1  ;;  %s423_s9 = scalar_lea.vmem [#allocation5], %s1529_s12 }
  0xb3   : > { %s428_s6 = sadd.s32 %s2251_s14, %s1530_s21  ;;  %s432_s23 = sshll.u32 %s423_s9, 4  ;;  %s2643_s23 = int_to_ptr.vmem [resolvable:$true] %s432_s23 }
  0xb4   : > { %s1531_s19 = sshll.u32 %s428_s6, 7  ;;  %s3067_s27 = sld [smem:[#allocation37_spill]] }
  0xb5   : > { %p3069_p0 = scmp.lt.s32.totalorder %s2259_s16, 4  ;;  %s2007_s1 = scalar_lea.hbm %s2559_s7, 256 }
  0xb6   : > { %p2008_p4 = scmp.ne.s32.totalorder %s2559_s7, %s2007_s1  ;;  %p3071_p10 = pneg %p2515_p12 }
  0xb7   : > { %p2654_p6 = pnand %p3069_p0, %p2599_p11  ;;  %s2012_s6 = scalar_lea.hbm %s2980_s2, 512 }
  0xb8   : > { %p2010_p1 = pnand %p2008_p4, %p3071_p10  ;;  %p2013_p5 = scmp.lt.u32.totalorder %s2559_s7, %s2980_s2 }
  0xb9   : > { %p2014_p7 = scmp.lt.u32.totalorder %s2012_s6, %s2007_s1  ;;  %p2016_p11 = scmp.lt.u32.totalorder %s2007_s1, %s2559_s7 }
  0xba   : > { %s3068_s20 = smov %s3067_s27  ;;  %s2648_s18 = scalar_lea.hbm %s3067_s27, %s1531_s19 }
  0xbb   : > { %p2011_p9 = pneg %p2010_p1  ;;  %p2015_p2 = por %p2014_p7, %p2013_p5 }
  0xbd   : > { %p2017_p0 = por %p2016_p11, %p2015_p2 }
  0xbf   : > { %p2018_p8 = pnand %p2017_p0, %p2011_p9 }
  0xc1   : > { %2021 = shalt.err (!%p2018_p8)
}
  0xc2   : > { %s2022_s27 = scalar_lea.vmem %s2562_s22, 256  ;;  %s2269_s19 = smov [#allocation10]  }
  0xc3   : > { %p2023_p4 = scmp.ne.s32.totalorder %s2562_s22, %s2022_s27  ;;  %s2027_s4 = sshll.u32 %s2269_s19, 4  ;;  %s2028_s4 = int_to_ptr.vmem [resolvable:$false] %s2027_s4 }
  0xc4   : > { %s2029_s11 = scalar_lea.vmem %s2028_s4, 512  ;;  %p2030_p13 = scmp.lt.s32.totalorder %s2562_s22, %s2028_s4 }
  0xc5   : > { %p2025_p1 = pnand %p2023_p4, %p3071_p10  ;;  %p2031_p5 = scmp.lt.s32.totalorder %s2029_s11, %s2022_s27 }
  0xc7   : > { %p2026_p3 = pneg %p2025_p1  ;;  %p2032_p7 = por %p2031_p5, %p2030_p13 }
  0xc9   : > { %p2033_p2 = pnand %p2032_p7, %p2026_p3 }
  0xcb   : > { %2036 = shalt.err (!%p2033_p2)
}
  0xcc   : > { %s3072_s1 = smov 8   ;;  %s3073_s9 = smov 128  }
  0xcd   : > { %1730 = dma.hbm_to_vmem [thread:$0]  (!%p2515_p12), %s2559_s7, 256, %s2562_s22, %s2523_s3, %s3073_s9, %s3073_s9, %s3072_s1  }
  0xce   : > { %s420_s21 = scalar_lea.sflag [#allocation6], %s419_s13  ;;  %s2037_s6 = scalar_lea.hbm %s2648_s18, 128 }
  0xcf   : > { %p2038_p13 = scmp.ne.s32.totalorder %s2648_s18, %s2037_s6  ;;  %p2039_p3 = pneg %p2654_p6 }
  0xd0   : > { %s2042_s25 = scalar_lea.hbm %s3068_s20, 512  ;;  %p2043_p11 = scmp.lt.u32.totalorder %s2648_s18, %s3068_s20 }
  0xd1   : > { %p2040_p8 = pnand %p2039_p3, %p2038_p13  ;;  %p2044_p0 = scmp.lt.u32.totalorder %s2042_s25, %s2037_s6 }
  0xd2   : > { %p2046_p4 = scmp.lt.u32.totalorder %s2037_s6, %s2648_s18 }
  0xd3   : > { %p2041_p9 = pneg %p2040_p8  ;;  %p2045_p12 = por %p2044_p0, %p2043_p11 }
  0xd5   : > { %p2047_p10 = por %p2046_p4, %p2045_p12 }
  0xd7   : > { %p2048_p1 = pnand %p2047_p10, %p2041_p9 }
  0xd9   : > { %2051 = shalt.err (!%p2048_p1)
}
  0xda   : > { %s2052_s3 = scalar_lea.vmem %s2643_s23, 128  ;;  %s2270_s7 = smov [#allocation5]  }
  0xdb   : > { %p2053_p5 = scmp.ne.s32.totalorder %s2643_s23, %s2052_s3  ;;  %s2057_s22 = sshll.u32 %s2270_s7, 4  ;;  %s2058_s22 = int_to_ptr.vmem [resolvable:$false] %s2057_s22 }
  0xdc   : > { %s2059_s13 = scalar_lea.vmem %s2058_s22, 256  ;;  %p2060_p13 = scmp.lt.s32.totalorder %s2643_s23, %s2058_s22 }
  0xdd   : > { %p2055_p7 = pnand %p2053_p5, %p2039_p3  ;;  %p2061_p8 = scmp.lt.s32.totalorder %s2059_s13, %s2052_s3 }
  0xdf   : > { %p2056_p2 = pneg %p2055_p7  ;;  %p2062_p11 = por %p2061_p8, %p2060_p13 }
  0xe1   : > { %p2063_p0 = pnand %p2062_p11, %p2056_p2 }
  0xe3   : > { %2066 = shalt.err (!%p2063_p0)
}
  0xe4   : > { %s3074_s4 = sld [smem:[#allocation26_spill]]  ;;  %s3075_s11 = sld [smem:[#allocation25_spill]] }
  0xe5   : > { %s3076_s1 = sld [smem:[#allocation24_spill]]  ;;  %p3077_p3 = scmp.eq.s32.totalorder %s2595_s5, 0 }
  0xe6   : > { %1724 = dma.hbm_to_vmem [thread:$0]  (!%p2654_p6), %s2648_s18, 128, %s2643_s23, %s420_s21  }
  0xe7   : > { %p3078_p4 = scmp.eq.s32.totalorder %s2259_s16, 0  ;;  %p3079_p1 = scmp.eq.s32.totalorder %s2419_s17, 0 }
  0xe8   : > { %s1539_s25 = sshll.u32 %s2251_s14, 7  ;;  %s3081_s3 = sld [smem:[#allocation39_spill]] }
  0xe9   : > { %p3082_p6 = scmp.lt.s32.totalorder %s2259_s16, 4  ;;  %s3084_s7 = sand.u32 1, %s2259_s16  }
  0xea   : > { %s134_s9 = sadd.s32 1, %s3074_s4  ;;  %p141_p9 = scmp.ne.s32.totalorder %s3074_s4, %s3075_s11 }
  0xeb   : > { %s2716_s6 = scalar_select %p3077_p3, %s3074_s4, %s134_s9  }
  0xec   : > { %p147_p12 = scmp.ne.s32.totalorder %s3075_s11, %s3076_s1  ;;  %s483_s30 = sand.u32 1, %s3074_s4  }
  0xed   : > { %p143_p10 = por %p141_p9, %p3078_p4  ;;  %s1538_s12 = sshll.u32 %s483_s30, 3 }
  0xee   : > { %p2727_p5 = por %p147_p12, %p3079_p1  ;;  %s2735_s18 = scalar_lea.hbm %s3081_s3, %s1539_s25 }
  0xef   : > { %s485_s5 = scalar_lea.vmem [#allocation11], %s1538_s12  ;;  %p2739_p7 = pnand %p3082_p6, %p143_p10 }
  0xf0   : > { %s492_s23 = sshll.u32 %s485_s5, 4  ;;  %s482_s22 = scalar_lea.sflag [#allocation12], %s3084_s7  ;;  %s2743_s23 = int_to_ptr.vmem [resolvable:$true] %s492_s23 }
  0xf1   : > { %s2067_s13 = scalar_lea.hbm %s2735_s18, 128  ;;  %p2069_p13 = pneg %p2739_p7 }
  0xf2   : > { %p2068_p2 = scmp.ne.s32.totalorder %s2735_s18, %s2067_s13  ;;  %s2072_s1 = scalar_lea.hbm %s3081_s3, 256 }
  0xf3   : > { %p2073_p0 = scmp.lt.u32.totalorder %s2735_s18, %s3081_s3  ;;  %p2074_p3 = scmp.lt.u32.totalorder %s2072_s1, %s2067_s13 }
  0xf4   : > { %p2070_p8 = pnand %p2069_p13, %p2068_p2  ;;  %p2076_p12 = scmp.lt.u32.totalorder %s2067_s13, %s2735_s18 }
  0xf5   : > { %p2075_p9 = por %p2074_p3, %p2073_p0 }
  0xf6   : > { %p2071_p11 = pneg %p2070_p8 }
  0xf7   : > { %p2077_p4 = por %p2076_p12, %p2075_p9 }
  0xf9   : > { %p2078_p10 = pnand %p2077_p4, %p2071_p11 }
  0xfb   : > { %2081 = shalt.err (!%p2078_p10)
}
  0xfc   : > { %s2082_s12 = scalar_lea.vmem %s2743_s23, 128  ;;  %s2271_s25 = smov [#allocation11]  }
  0xfd   : > { %p2083_p1 = scmp.ne.s32.totalorder %s2743_s23, %s2082_s12  ;;  %s2087_s27 = sshll.u32 %s2271_s25, 4  ;;  %s2088_s27 = int_to_ptr.vmem [resolvable:$false] %s2087_s27 }
  0xfe   : > { %s2089_s19 = scalar_lea.vmem %s2088_s27, 256  ;;  %p2090_p8 = scmp.lt.s32.totalorder %s2743_s23, %s2088_s27 }
  0xff   : > { %p2085_p6 = pnand %p2083_p1, %p2069_p13  ;;  %p2091_p0 = scmp.lt.s32.totalorder %s2089_s19, %s2082_s12 }
 0x101   : > { %p2086_p2 = pneg %p2085_p6  ;;  %p2092_p3 = por %p2091_p0, %p2090_p8 }
 0x103   : > { %p2093_p9 = pnand %p2092_p3, %p2086_p2 }
 0x105   : > { %2096 = shalt.err (!%p2093_p9)
}
 0x106   : > { %1733 = dma.hbm_to_vmem [thread:$0]  (!%p2739_p7), %s2735_s18, 128, %s2743_s23, %s482_s22  }
 0x107   : > { %s3085_s5 = sld [smem:[#allocation31_spill]] }
 0x10d   : > { %p3086_p11 = scmp.ne.s32.totalorder %s3085_s5, 0 }
 0x10e   : > { %s3087_s7 = sld [smem:[#allocation35_spill]] (!%p3086_p11)  ;;  %s2775_s13 = sand.u32 (!%p3086_p11), 1, %s2235_s28  }
 0x10f   : > { %501 = sbr.rel (%p3086_p11) target bundleno = 1724 (0x6bc), region = 68  ;;  %s1541_s4 = sshll.u32 (!%p3086_p11), %s2775_s13, 3 }
 0x110   : > { %s504_s11 = scalar_lea.sflag (!%p3086_p11), [#allocation6], %s2775_s13  ;;  %s2779_s1 = scalar_lea.vmem (!%p3086_p11), [#allocation5], %s1541_s4 }
 0x114   : > { %p3088_p13 = scmp.ne.s32.totalorder (!%p3086_p11), %s3087_s7, 0 }
 0x116   : > { %2182 = dma.done.wait (%p3088_p13), %s504_s11, 128  }
 0x117   : > { %2184 = vsyncadd (%p3088_p13), %s504_s11, 4294967168  ;;  %s3089_s18 = sld [smem:[#allocation27_spill]]  ;;  %s512_s21 = sand.u32 1, %s2419_s17  }
 0x118   : > { %s3090_s23 = sld [smem:[#allocation32_spill]]  ;;  %s513_s30 = scalar_lea.sflag [#allocation9], %s512_s21 }
 0x11d   : > { %s514_s22 = sand.u32 1, %s3089_s18  }
 0x11e   : > { %s2787_s9 = sshll.u32 %s514_s22, 4  ;;  %p3091_p7 = scmp.ne.s32.totalorder %s3090_s23, 0 }
 0x11f   : > { %s516_s12 = scalar_lea.vmem [#allocation8], %s2787_s9 }
 0x120   : > { %2186 = dma.done.wait (%p3091_p7), %s513_s30, 512  }
 0x121   : > { %2188 = vsyncadd (%p3091_p7), %s513_s30, 4294966784  ;;  %s3092_s25 = sld [smem:[#allocation25_spill]]  ;;  %s525_s5 = scalar_lea.vmem [#allocation10], %s2787_s9 }
 0x122   : > { %s531_s7 = scalar_lea.sflag [#allocation12], %s512_s21 }
 0x127   : > { %s532_s27 = sand.u32 1, %s3092_s25  }
 0x128   : > { %s2795_s19 = sshll.u32 %s532_s27, 3 }
 0x129   : > { %s534_s11 = scalar_lea.vmem [#allocation11], %s2795_s19 }
 0x12a   : > { %2190 = dma.done.wait (%p2727_p5), %s531_s7, 128  }
 0x12b   : > { %2192 = vsyncadd (%p2727_p5), %s531_s7, 4294967168  ;;  %p3093_p12 = scmp.eq.s32.totalorder %s2419_s17, 0 }
 0x12d   : > { %2194 = dma.done.wait (%p3093_p12), [#allocation12], 256   ;;  %p3094_p4 = pmov %p3093_p12 }
 0x12f   : > { %2196 = vsyncadd (%p3094_p4), [#allocation12], 4294967040  ;;  %p3095_p10 = pmov %p3094_p4 }
 0x130   : > { %p3096_p1 = pmov %p3094_p4 }
 0x131   : > { %2198 = dma.done.wait (%p3095_p10), [#allocation15], 272  }
 0x132   : > { %2200 = vsyncadd (%p3096_p1), [#allocation15], 4294967024  ;;  %s2811_s18 = scalar_lea.vmem [#allocation17], %s1541_s4  ;;  %s3097_s23 = sld [smem:[#allocation29_spill]] }
 0x138   : > { %p1549_p6 = scmp.ne.s32.totalorder %s3097_s23, 0 }
 0x139   : > { %s3098_s22 = sld [smem:[#allocation42_spill]] (!%p1549_p6)  ;;  %v2272_v1 = vmov (!%p1549_p6), 0.0   ;;  %v1876_v2 = vld [vmem:[#allocation14] sm:$0xff] (!%p1549_p6)   ;;  %vm2273_vm0 = vmmov (!%p1549_p6), 0   ;;  %v1878_v4 = vld [vmem:[#allocation14 + $0x8] sm:$0xff] (!%p1549_p6)   ;;  %vm636_vm1 = vcmask (!%p1549_p6), 261120  }
 0x13a   : > { %606 = sbr.rel (%p1549_p6) target bundleno = 546 (0x222), region = 100  ;;  %1609 = vmatprep.subr.bf16.mxu0 (!%p1549_p6), %v2272_v1  ;;  %1617 = vmatprep.subr.bf16.mxu1 (!%p1549_p6), %v2272_v1  ;;  %v607_v5 = vld [vmem:[%s516_s12] sm:$0xff] (!%p1549_p6)  ;;  %v608_v6 = vld [vmem:[%s516_s12 + $0x8] sm:$0xff] (!%p1549_p6)  ;;  %s3100_s27 = sld [smem:[#allocation43_spill]] (!%p1549_p6) }
 0x13b   : > { %1613 = vmatprep.mubr.msk.bf16.mxu0 (!%p1549_p6), %vm2273_vm0, %v2272_v1  ;;  %1618 = vmatpush3.bf16.msra.mxu1 (!%p1549_p6), %v1876_v2  ;;  %v610_v7 = vld [vmem:[%s525_s5] sm:$0xff] (!%p1549_p6)  ;;  %v609_v8 = vpack.c.bf16 (!%p1549_p6), %v608_v6, %v607_v5  ;;  %v611_v9 = vld [vmem:[%s525_s5 + $0x8] sm:$0xff] (!%p1549_p6) }
 0x13c   : > { %1619 = vmatprep.subr.bf16.mxu1 (!%p1549_p6), %v2272_v1  ;;  %1621 = vmatprep.mubr.msk.bf16.mxu1 (!%p1549_p6), %vm2273_vm0, %v2272_v1  ;;  %v612_v10 = vpack.c.bf16 (!%p1549_p6), %v611_v9, %v610_v7  ;;  %v1554_v13 = vld [vmem:[#allocation16] ss:$0 sm:$0xff] (!%p1549_p6) }
 0x13f   : > { %s3099_s7 = smov (!%p1549_p6), %s3098_s22  ;;  %v1875_v0 = vld [vmem:[%s3098_s22] sm:$0xff] (!%p1549_p6)   ;;  %1620 = vmatpush3.bf16.msra.mxu1 (!%p1549_p6), %v1878_v4 }
 0x140   : > { %1610 = vmatpush3.bf16.msra.mxu0 (!%p1549_p6), %v1875_v0  ;;  %v1877_v3 = vld [vmem:[%s3099_s7 + $0x8] sm:$0xff] (!%p1549_p6)   ;;  %v1550_v11 = vld [vmem:[%s3100_s27] ss:$0 sm:$0xff] (!%p1549_p6) }
 0x141   : > { %1611 = vmatprep.subr.bf16.mxu0 %v2272_v1 }
 0x142   : > { %1622 = vmatmul.mubr.msk.bf16.vlgmr.msra.gmra.mrb[0].mxu1 %vm636_vm1, %v612_v10 }
 0x144   : > { %1612 = vmatpush3.bf16.msra.mxu0 %v1877_v3 }
 0x147   : > { %1614 = vmatmul.mubr.msk.bf16.vlgmr.msra.gmra.mrb[0].mxu0 %vm636_vm1, %v609_v8 }
 0x215   : > { %v743_v14 = vpop.f32.mrb[0].mxu1 }
 0x216   : > { %v1623_v16 = vpop.f32.mrb[1].mxu1  ;;  %v744_v22 = vadd.f32 %v1554_v13, %v743_v14 }
 0x217   : > { %v746_v20 = vpop.f32.mrb[2].mxu1 }
 0x218   : > { %v747_v23 = vadd.f32 %v1554_v13, %v746_v20  ;;  %v1624_v24 = vpop.f32.mrb[3].mxu1 }
 0x21a   : > { %v674_v12 = vpop.f32.mrb[0].mxu0  ;;  %v750_v26 = vpack.c.bf16 %v747_v23, %v744_v22 }
 0x21b   : > { %v1615_v15 = vpop.f32.mrb[1].mxu0  ;;  %v675_v18 = vadd.f32 %v1550_v11, %v674_v12 }
 0x21c   : > { %v677_v17 = vpop.f32.mrb[2].mxu0  ;;  %751 = vst.msk [vmem:[#allocation3] sm:$0xff] %vm636_vm1, %v750_v26 }
 0x21d   : > { %v678_v19 = vadd.f32 %v1550_v11, %v677_v17  ;;  %v1616_v21 = vpop.f32.mrb[3].mxu0 }
 0x21f   : > { %v681_v25 = vpack.c.bf16 %v678_v19, %v675_v18 }
 0x221   : > { %682 = vst.msk [vmem:[#allocation2] sm:$0xff] %vm636_vm1, %v681_v25 }
 0x222 PF: > { %v1879_v27 = vld [vmem:[#allocation13] sm:$0xff]   ;;  %v2274_v28 = vmov 0.0   ;;  %v1880_v29 = vld [vmem:[#allocation13 + $0x8] sm:$0xff]   ;;  %vm2275_vm2 = vmmov 0   ;;  %vm826_vm3 = vcmask 64512   ;;  %s2276_s9 = smov 120  }
 0x223   : > { %1625 = vmatprep.subr.bf16.mxu0 %v2274_v28  ;;  %1633 = vmatprep.subr.bf16.mxu1 %v2274_v28  ;;  %v752_v30 = vld [vmem:[%s2779_s1] sm:$0xff]  ;;  %vm777_vm4 = vcmask 261120   ;;  %s2277_s12 = smov 112   ;;  %s3101_s23 = sld [smem:[#allocation41_spill]]  ;;  %v823_v45 = vld [vmem:[#allocation3] sm:$0xff]  ;;  %vm1050_vm6 = vcmask 130048  }
 0x224   : > { %1626 = vmatpush3.bf16.msra.mxu0 %v1879_v27  ;;  %1629 = vmatprep.mubr.msk.bf16.mxu0 %vm2275_vm2, %v2274_v28  ;;  %v753_v33 = vpack.c.bf16 %v752_v30, %v752_v30  ;;  %s2278_s21 = smov 104   ;;  %v824_v56 = vld [vmem:[%s534_s11] sm:$0xff]  ;;  %s3102_s10 = sld [smem:[#allocation46_spill]]  ;;  %vm1148_vm7 = vcmask 130112   ;;  %vm1202_vm8 = vcmask 195712   ;;  %vm1256_vm9 = vcmask 261312  }
 0x225   : > { %1627 = vmatprep.subr.bf16.mxu0 %v2274_v28  ;;  %1635 = vmatprep.mubr.msk.bf16.mxu1 %vm2275_vm2, %v2274_v28  ;;  %vm825_vm5 = vcmp.eq.f32.partialorder %v824_v56, 0.0  ;;  %s2279_s25 = smov 8   ;;  %s2280_s17 = smov 16  }
 0x226   : > { %s2281_s4 = smov 24   ;;  %s3103_s27 = sld [smem:[#allocation30_spill]] }
 0x227   : > { %s1343_s11 = sshll.u32 %s2811_s18, 4  ;;  %p3108_p2 = scmp.ne.s32.totalorder %s3062_s24, 0  ;;  %s2900_s11 = int_to_ptr.vmem [resolvable:$true] %s1343_s11 }
 0x228   : > { %v822_v31 = vld [vmem:[#allocation2] sm:$0xff]  ;;  %1628 = vmatpush3.bf16.msra.mxu0 %v1880_v29 }
 0x229   : > { %878 = vrot.lane.b32.xlu0 %v822_v31, %s2276_s9  ;;  %v831_v32 = vsel %vm826_vm3, %v822_v31, 0  ;;  %1639 = vmatprep.subr.bf16.mxu0 %v2274_v28  ;;  %v1558_v36 = vld [vmem:[%s3101_s23] ss:$0 sm:$0xff] }
 0x22a   : > { %1634 = vmatpush3.bf16.xpose.msra.mxu1 %v831_v32 }
 0x22b   : > { %1645 = vmatprep.subr.bf16.mxu1 %v2274_v28  ;;  %1630 = vmatmul.mubr.msk.bf16.vlgmr.msra.gmra.mrb[0].mxu0 %vm777_vm4, %v753_v33 }
 0x22c   : > { %1641 = vmatprep.mubr.msk.bf16.mxu0 %vm2275_vm2, %v2274_v28 }
 0x22d   : > { %929 = vrot.lane.b32.xlu0 %v822_v31, %s2277_s12 }
 0x29b   : > { %v879_v34 = vpop.permute.xlu0 %878 }
 0x29c   : > { %v884_v35 = vsel %vm826_vm3, %v879_v34, 0 }
 0x29d   : > { %1640 = vmatpush3.bf16.xpose.msra.mxu0 %v884_v35 }
 0x29e   : > { %1651 = vmatprep.subr.bf16.mxu0 %v2274_v28 }
 0x29f   : > { %v930_v40 = vpop.permute.xlu0 %929 }
 0x2a0   : > { %v935_v44 = vsel %vm826_vm3, %v930_v40, 0  ;;  %v1882_v40 = vld [vmem:[%s3102_s10 + $0x8] sm:$0xff]  }
 0x2fe   : > { %v815_v37 = vpop.f32.mrb[0].mxu0 }
 0x2ff   : > { %v816_v38 = vadd.f32 %v1558_v36, %v815_v37  ;;  %v1631_v39 = vpop.f32.mrb[1].mxu0 }
 0x300   : > { %v818_v41 = vpop.f32.mrb[2].mxu0  ;;  %v1881_v39 = vld [vmem:[%s3102_s10] sm:$0xff]  }
 0x301   : > { %v821_v42 = vpack.c.bf16 %v816_v38, %v816_v38  ;;  %v1632_v43 = vpop.f32.mrb[3].mxu0 }
 0x303   : > { %927 = vrot.lane.b32.xlu0 %v821_v42, %s2277_s12  ;;  %875 = vrot.lane.b32.xlu1 %v821_v42, %s2276_s9 }
 0x304   : > { %1636 = vmatmul.mubr.msk.bf16.vlgmr.msra.gmra.mrb[0].mxu1 %vm826_vm3, %v821_v42 }
 0x305   : > { %1646 = vmatpush3.bf16.xpose.msra.mxu1 %v935_v44  ;;  %1647 = vmatprep.mubr.msk.bf16.mxu1 %vm2275_vm2, %v2274_v28 }
 0x306   : > { %1657 = vmatprep.subr.bf16.mxu1 %v2274_v28 }
 0x307   : > { %980 = vrot.lane.b32.xlu1 %v822_v31, %s2278_s21  ;;  %1098 = vrot.lane.b32.xlu0 %v823_v45, %s2276_s9  ;;  %s3104_s9 = sld [smem:[#allocation29_spill]] }
 0x30b   : > { %978 = vrot.lane.b32.xlu1 %v821_v42, %s2278_s21  ;;  %1206 = vrot.lane.b32.xlu0 %v823_v45, %s2278_s21  ;;  %s3105_s21 = sld [smem:[#allocation47_spill]] }
 0x30f   : > { %1152 = vrot.lane.b32.xlu1 %v823_v45, %s2277_s12  ;;  %s1575_s12 = sshll.u32 %s3103_s27, 1  ;;  %s1328_s27 = scalar_lea.sflag [#allocation7], %s2775_s13 }
 0x310   : > { %s1339_s1 = sadd.s32 %s3104_s9, %s1575_s12  ;;  %s2097_s9 = scalar_lea.vmem %s2900_s11, 128 }
 0x311   : > { %s1576_s19 = sshll.u32 %s1339_s1, 7  ;;  %p2098_p5 = scmp.ne.s32.totalorder %s2900_s11, %s2097_s9 }
 0x312   : > { %s2282_s12 = smov [#allocation17]  }
 0x313   : > { %p2099_p8 = pnand %p2098_p5, %p3108_p2  ;;  %s2101_s1 = sshll.u32 %s2282_s12, 4  ;;  %s2102_s1 = int_to_ptr.vmem [resolvable:$false] %s2101_s1 }
 0x314   : > { %s2103_s5 = scalar_lea.vmem %s2102_s1, 256  ;;  %p2104_p3 = scmp.lt.s32.totalorder %s2900_s11, %s2102_s1 }
 0x315   : > { %p2100_p0 = pneg %p2099_p8  ;;  %p2105_p9 = scmp.lt.s32.totalorder %s2103_s5, %s2097_s9 }
 0x317   : > { %p2106_p11 = por %p2105_p9, %p2104_p3 }
 0x319   : > { %p2107_p13 = pnand %p2106_p11, %p2100_p0 }
 0x375   : > { %v928_v46 = vpop.permute.xlu0 %927  ;;  %v876_v47 = vpop.permute.xlu1 %875 }
 0x376   : > { %1642 = vmatmul.mubr.msk.bf16.vlgmr.msra.gmra.mrb[4].mxu0 %vm826_vm3, %v876_v47  ;;  %1648 = vmatmul.mubr.msk.bf16.vlgmr.msra.gmra.mrb[4].mxu1 %vm826_vm3, %v928_v46 }
 0x377   : > { %1653 = vmatprep.mubr.msk.bf16.mxu0 %vm2275_vm2, %v2274_v28  ;;  %1658 = vmatpush3.bf16.msra.mxu1 %v823_v45 }
 0x378   : > { %1659 = vmatprep.mubr.msk.bf16.mxu1 %vm2275_vm2, %v2274_v28  ;;  %1669 = vmatprep.subr.bf16.mxu1 %v2274_v28 }
 0x379   : > { %v981_v48 = vpop.permute.xlu1 %980  ;;  %v1099_v55 = vpop.permute.xlu0 %1098 }
 0x37a   : > { %v986_v49 = vsel %vm826_vm3, %v981_v48, 0 }
 0x37b   : > { %1652 = vmatpush3.bf16.xpose.msra.mxu0 %v986_v49 }
 0x37c   : > { %1663 = vmatprep.subr.bf16.mxu0 %v2274_v28 }
 0x37d   : > { %v979_v50 = vpop.permute.xlu1 %978  ;;  %v1207_v36 = vpop.permute.xlu0 %1206 }
 0x381   : > { %v1153_v33 = vpop.permute.xlu1 %1152 }
 0x382   : > { %1654 = vmatmul.mubr.msk.bf16.vlgmr.msra.gmra.mrb[8].mxu0 %vm826_vm3, %v979_v50 }
 0x383   : > { %1665 = vmatprep.mubr.msk.bf16.mxu0 %vm2275_vm2, %v2274_v28  ;;  %1664 = vmatpush3.bf16.msra.mxu0 %v1099_v55 }
 0x384   : > { %1675 = vmatprep.subr.bf16.mxu0 %v2274_v28 }
 0x3d7   : > { %v867_v51 = vpop.f32.mrb[0].mxu1 }
 0x3d8   : > { %v1637_v52 = vpop.f32.mrb[1].mxu1  ;;  %v873_v59 = vsel %vm825_vm5, -1e+09, %v867_v51 }
 0x3d9   : > { %v870_v53 = vpop.f32.mrb[2].mxu1 }
 0x3da   : > { %v1638_v54 = vpop.f32.mrb[3].mxu1 }
 0x449   : > { %v920_v57 = vpop.f32.mrb[4].mxu0  ;;  %v971_v58 = vpop.f32.mrb[4].mxu1 }
 0x44a   : > { %v926_v60 = vsel %vm825_vm5, -1e+09, %v920_v57  ;;  %v1643_v61 = vpop.f32.mrb[5].mxu0  ;;  %v1649_v62 = vpop.f32.mrb[5].mxu1  ;;  %v977_v2 = vsel %vm825_vm5, -1e+09, %v971_v58 }
 0x44b   : > { %v1029_v63 = vmax.f32 %v873_v59, %v926_v60  ;;  %v923_v0 = vpop.f32.mrb[6].mxu0  ;;  %v974_v1 = vpop.f32.mrb[6].mxu1  ;;  %v1570_v61 = vld [vmem:[%s3105_s21] ss:$0 sm:$0xff] }
 0x44c   : > { %v1644_v3 = vpop.f32.mrb[7].mxu0  ;;  %v1650_v4 = vpop.f32.mrb[7].mxu1 }
 0x44d   : > { %v1030_v5 = vmax.f32 %v1029_v63, %v977_v2 }
 0x455   : > { %v1022_v6 = vpop.f32.mrb[8].mxu0 }
 0x456   : > { %v1028_v7 = vsel %vm825_vm5, -1e+09, %v1022_v6  ;;  %v1655_v8 = vpop.f32.mrb[9].mxu0 }
 0x457   : > { %v1031_v9 = vmax.f32 %v1030_v5, %v1028_v7  ;;  %v1025_v10 = vpop.f32.mrb[10].mxu0 }
 0x458   : > { %v1656_v11 = vpop.f32.mrb[11].mxu0 }
 0x459   : > { %v1032_v12 = vsub.f32 %v873_v59, %v1031_v9  ;;  %v1035_v13 = vsub.f32 %v926_v60, %v1031_v9  ;;  %v1038_v14 = vsub.f32 %v977_v2, %v1031_v9  ;;  %v1041_v15 = vsub.f32 %v1028_v7, %v1031_v9 }
 0x45b   : > { %v1033_v16 = vmul.f32 1.442695, %v1032_v12  ;;  %v1036_v17 = vmul.f32 1.442695, %v1035_v13  ;;  %v1039_v18 = vmul.f32 1.442695, %v1038_v14 }
 0x45c   : > { %v1042_v19 = vmul.f32 1.442695, %v1041_v15 }
 0x45d   : > { %1883 = vpow2.f32 %v1033_v16 }
 0x45e   : > { %1885 = vpow2.f32 %v1036_v17 }
 0x45f   : > { %1887 = vpow2.f32 %v1039_v18 }
 0x460   : > { %1889 = vpow2.f32 %v1042_v19 }
 0x467   : > { %v1884_v20 = vpop.eup %1883 }
 0x468   : > { %v1886_v21 = vpop.eup %1885 }
 0x469   : > { %v1044_v22 = vadd.f32 %v1886_v21, %v1884_v20  ;;  %v1888_v23 = vpop.eup %1887 }
 0x46a   : > { %v1890_v25 = vpop.eup %1889 }
 0x46b   : > { %v1045_v24 = vadd.f32 %v1888_v23, %v1044_v22 }
 0x46d   : > { %v1046_v26 = vadd.f32 %v1890_v25, %v1045_v24 }
 0x46f   : > { %1891 = vrcp.f32 %v1046_v26 }
 0x479   : > { %v1892_v27 = vpop.eup %1891 }
 0x47a   : > { %v1048_v29 = vmul.f32 %v1892_v27, %v1884_v20  ;;  %v1095_v30 = vmul.f32 %v1892_v27, %v1886_v21  ;;  %v1150_v31 = vmul.f32 %v1892_v27, %v1888_v23  ;;  %v1204_v32 = vmul.f32 %v1892_v27, %v1890_v25 }
 0x47c   : > { %v1049_v34 = vpack.c.bf16 %v1048_v29, %v1048_v29  ;;  %v1096_v35 = vpack.c.bf16 %v1095_v30, %v1095_v30  ;;  %v1151_v37 = vpack.c.bf16 %v1150_v31, %v1150_v31  ;;  %v1205_v38 = vpack.c.bf16 %v1204_v32, %v1204_v32 }
 0x47e   : > { %1660 = vmatmul.mubr.msk.bf16.vlgmr.msra.gmra.mrb[8].mxu1 %vm1050_vm6, %v1049_v34  ;;  %1666 = vmatmul.mubr.msk.bf16.vlgmr.msra.gmra.mrb[12].mxu0 %vm1050_vm6, %v1096_v35 }
 0x47f   : > { %1670 = vmatpush3.bf16.msra.mxu1 %v1153_v33  ;;  %1676 = vmatpush3.bf16.msra.mxu0 %v1207_v36 }
 0x480   : > { %1671 = vmatprep.mubr.msk.bf16.mxu1 %vm2275_vm2, %v2274_v28  ;;  %1677 = vmatprep.mubr.msk.bf16.mxu0 %vm2275_vm2, %v2274_v28 }
 0x481   : > { %1681 = vmatprep.subr.bf16.mxu1 %v2274_v28 }
 0x486   : > { %1672 = vmatmul.mubr.msk.bf16.vlgmr.msra.gmra.mrb[12].mxu1 %vm1050_vm6, %v1151_v37  ;;  %1678 = vmatmul.mubr.msk.bf16.vlgmr.msra.gmra.mrb[16].mxu0 %vm1050_vm6, %v1205_v38 }
 0x487   : > { %1685 = vmatprep.mubr.msk.bf16.mxu1 %vm2275_vm2, %v2274_v28  ;;  %1682 = vmatpush3.bf16.msra.mxu1 %v1881_v39 }
 0x488   : > { %1683 = vmatprep.subr.bf16.mxu1 %v2274_v28 }
 0x48b   : > { %1684 = vmatpush3.bf16.msra.mxu1 %v1882_v40 }
 0x551   : > { %v1088_v41 = vpop.f32.mrb[8].mxu1  ;;  %v1138_v42 = vpop.f32.mrb[12].mxu0 }
 0x552   : > { %1094 = vst.msk [vmem:[#allocation4] sm:$0xff] %vm826_vm3, %v1088_v41  ;;  %v1661_v43 = vpop.f32.mrb[9].mxu1  ;;  %1145 = vrot.lane.b32.xlu1 %v1138_v42, %s2279_s25  ;;  %v1667_v44 = vpop.f32.mrb[13].mxu0  ;;  %s3106_s25 = sld [smem:[#allocation48_spill]] }
 0x553   : > { %v1091_v45 = vpop.f32.mrb[10].mxu1  ;;  %v1141_v46 = vpop.f32.mrb[14].mxu0 }
 0x554   : > { %v1662_v47 = vpop.f32.mrb[11].mxu1  ;;  %v1668_v48 = vpop.f32.mrb[15].mxu0 }
 0x559   : > { %v1192_v49 = vpop.f32.mrb[12].mxu1  ;;  %v1246_v50 = vpop.f32.mrb[16].mxu0 }
 0x55a   : > { %1199 = vrot.lane.b32.xlu0 %v1192_v49, %s2280_s17  ;;  %v1673_v51 = vpop.f32.mrb[13].mxu1  ;;  %1253 = vrot.lane.b32.xlu1 %v1246_v50, %s2281_s4  ;;  %v1679_v52 = vpop.f32.mrb[17].mxu0  ;;  %s3107_s17 = smov %s3106_s25  ;;  %s2898_s4 = scalar_lea.hbm %s3106_s25, %s1576_s19 }
 0x55b   : > { %v1195_v28 = vpop.f32.mrb[14].mxu1  ;;  %v1249_v53 = vpop.f32.mrb[18].mxu0 }
 0x55c   : > { %v1674_v54 = vpop.f32.mrb[15].mxu1  ;;  %v1680_v55 = vpop.f32.mrb[19].mxu0 }
 0x5c4   : > { %v1146_v56 = vpop.permute.xlu1 %1145 }
 0x5c5   : > { %1149 = vst.msk [vmem:[#allocation4] sm:$0xff] %vm1148_vm7, %v1146_v56 }
 0x5cc   : > { %v1200_v57 = vpop.permute.xlu0 %1199  ;;  %v1254_v58 = vpop.permute.xlu1 %1253 }
 0x5cd   : > { %1203 = vst.msk [vmem:[#allocation4] sm:$0xff] %vm1202_vm8, %v1200_v57 }
 0x5ce   : > { %1257 = vst.msk [vmem:[#allocation4] sm:$0xff] %vm1256_vm9, %v1254_v58 }
 0x5d5   : > { %v1258_v59 = vld [vmem:[#allocation4] sm:$0xff] }
 0x5d6   : > { %v1259_v60 = vpack.c.bf16 %v1258_v59, %v1258_v59 }
 0x5d8   : > { %1686 = vmatmul.mubr.msk.bf16.vlgmr.msra.gmra.mrb[16].mxu1 %vm777_vm4, %v1259_v60 }
 0x6ab   : > { %v1320_v62 = vpop.f32.mrb[16].mxu1 }
 0x6ac   : > { %v1321_v63 = vadd.f32 %v1570_v61, %v1320_v62  ;;  %v1687_v0 = vpop.f32.mrb[17].mxu1 }
 0x6ad   : > { %v1323_v1 = vpop.f32.mrb[18].mxu1 }
 0x6ae   : > { %1326 = vst.msk [vmem:[%s2811_s18] sm:$0xff] %vm777_vm4, %v1321_v63  ;;  %v1688_v2 = vpop.f32.mrb[19].mxu1 }
 0x6af   : > { %2110 = shalt.err (!%p2107_p13)
}
 0x6b0   : > { %s2111_s13 = scalar_lea.hbm %s2898_s4, 128  ;;  %s2115_s21 = scalar_lea.hbm %s3107_s17, 512 }
 0x6b1   : > { %p2112_p7 = scmp.ne.s32.totalorder %s2898_s4, %s2111_s13  ;;  %p2116_p10 = scmp.lt.u32.totalorder %s2898_s4, %s3107_s17 }
 0x6b2   : > { %p2117_p1 = scmp.lt.u32.totalorder %s2115_s21, %s2111_s13  ;;  %p2119_p5 = scmp.lt.u32.totalorder %s2111_s13, %s2898_s4 }
 0x6b3   : > { %p2113_p12 = pnand %p2112_p7, %p3108_p2 }
 0x6b4   : > { %p2118_p6 = por %p2117_p1, %p2116_p10 }
 0x6b5   : > { %p2114_p4 = pneg %p2113_p12 }
 0x6b6   : > { %p2120_p8 = por %p2119_p5, %p2118_p6 }
 0x6b8   : > { %p2121_p0 = pnand %p2120_p8, %p2114_p4 }
 0x6ba   : > { %2124 = shalt.err (!%p2121_p0)
}
 0x6bb   : > { %1709 = dma.vmem_to_hbm [thread:$0]  (%p3108_p2), %s2900_s11, 128, %s2898_s4, %s1328_s27  }
 0x6bc PF: > { %s3109_s30 = sld [smem:[#allocation28_spill]]  ;;  %s3110_s25 = sld [smem:[#allocation33_spill]] }
 0x6bd   : > { %p1745_p3 = scmp.ge.s32.totalorder %s2259_s16, 2 }
 0x6c2   : > { %s1355_s9 = sand.u32 1, %s3109_s30   ;;  %p3111_p9 = scmp.ne.s32.totalorder %s3110_s25, 0 }
 0x6c3   : > { %s1356_s12 = scalar_lea.sflag [#allocation7], %s1355_s9 }
 0x6c4   : > { %p1735_p11 = pnand %p1745_p3, %p3111_p9 }
 0x6c6   : > { %2202 = dma.done.wait (!%p1735_p11), %s1356_s12, 128  }
 0x6c7   : > { %2204 = vsyncadd (!%p1735_p11), %s1356_s12, 4294967168  ;;  %s35_s16 = sadd.s32 1, %s2259_s16   ;;  %s3113_s21 = sld [smem:[#allocation25_spill]] }
 0x6c8   : > { %p2931_p13 = scmp.ge.s32.totalorder %s35_s16, 6   ;;  %s3114_s22 = sld [smem:[#allocation26_spill]] }
 0x6c9   : > { %s3115_s24 = sld [smem:[#allocation27_spill]]  ;;  %s3116_s11 = sld [smem:[#allocation34_spill]] }
 0x6ca   : > { %s3117_s4 = sld [smem:[#allocation36_spill]]  ;;  %s3118_s23 = smov %s2716_s6 }
 0x6cb   : > { %s3119_s25 = smov %s2227_s26  ;;  %s3120_s26 = smov %s2634_s0 }
 0x6cc   : > { %s3121_s27 = smov %s2235_s28  ;;  %s3122_s28 = smov %s2239_s29 }
 0x6cd   : > { %s3123_s29 = smov %s2637_s8  ;;  %s3124_s30 = smov %s2251_s14 }
 0x6ce   : > { %s3125_s13 = smov %s2255_s15  ;;  %34 = sbr.rel (!%p2931_p13) target bundleno = 28 (0x1c), region = 166 }
 0x6cf   : > { %s3126_s14 = smov %s3116_s11 }
 0x6d0   : > { %s3127_s15 = smov %s3117_s4 }
 0x6d5   :  { %1361 = vsyncpa [#allocation6], 1 }
 0x6d6   :  { %1363 = vsyncpa [#allocation6 + $0x1], 1 }
 0x6d7   :  { %1364 = vsyncpa [#allocation9], 1 }
 0x6d8   :  { %1366 = vsyncpa [#allocation9 + $0x1], 1 }
 0x6d9   :  { %1367 = vsyncpa [#allocation12], 1 }
 0x6da   :  { %1369 = vsyncpa [#allocation12 + $0x1], 1 }
 0x6db   :  { %1370 = vsyncpa [#allocation15], 1 }
 0x6dc   :  { %1371 = vsyncpa [#allocation7], 1 }
 0x6dd   :  { %1373 = vsyncpa [#allocation7 + $0x1], 1 }

// kernel: tpu_custom_call.1
= control target key start
LH: loop header
LB: loop body
LE: loop exit
PB: predicated region body
PF: predicated region fallthrough
CT: control target
= control target key end

     0   :  { %s2978_s0 = inlined_call_operand.hbm [shape: f32[2,16,32], index: 0, kind: input, shape index: {}]   ;;  %s2979_s1 = inlined_call_operand.hbm [shape: f32[2,16,32], index: 1, kind: input, shape index: {}]   ;;  %s2980_s2 = inlined_call_operand.hbm [shape: f32[2,16,32], index: 2, kind: input, shape index: {}]   ;;  %s2981_s3 = inlined_call_operand.hbm [shape: f32[16,16], index: 3, kind: input, shape index: {}]   ;;  %s2982_s4 = inlined_call_operand.hbm [shape: bf16[32,32], index: 4, kind: input, shape index: {}]   ;;  %s2983_s5 = inlined_call_operand.vmem [shape: f32[1,32], index: 5, kind: input, shape index: {}]   ;;  %s2984_s6 = inlined_call_operand.vmem [shape: bf16[32,32], index: 6, kind: input, shape index: {}]   ;;  %s2985_s7 = inlined_call_operand.vmem [shape: f32[1,32], index: 7, kind: input, shape index: {}]   ;;  %s2986_s8 = inlined_call_operand.hbm [shape: bf16[32,32], index: 8, kind: input, shape index: {}]   ;;  %s2987_s9 = inlined_call_operand.hbm [shape: f32[1,32], index: 9, kind: input, shape index: {}]   ;;  %s2988_s10 = inlined_call_operand.vmem [shape: bf16[32,32], index: 10, kind: input, shape index: {}]   ;;  %s2989_s11 = inlined_call_operand.vmem [shape: f32[1,32], index: 11, kind: input, shape index: {}]   ;;  %s2990_s12 = inlined_call_operand.hbm [shape: f32[2,16,32], index: 12, kind: output, shape index: {}]  }
   0x1   :  { %3022 = sst [smem:[#allocation37_spill]] %s2978_s0 }
   0x2   :  { %3023 = sst [smem:[#allocation38_spill]] %s2979_s1 }
   0x3   :  { %3024 = sst [smem:[#allocation39_spill]] %s2981_s3 }
   0x4   :  { %3025 = sst [smem:[#allocation40_spill]] %s2982_s4 }
   0x5   :  { %3026 = sst [smem:[#allocation41_spill]] %s2983_s5 }
   0x6   :  { %3027 = sst [smem:[#allocation42_spill]] %s2984_s6 }
   0x7   :  { %3028 = sst [smem:[#allocation43_spill]] %s2985_s7 }
   0x8   :  { %3029 = sst [smem:[#allocation44_spill]] %s2986_s8 }
   0x9   :  { %3030 = sst [smem:[#allocation45_spill]] %s2987_s9 }
   0xa   :  { %3031 = sst [smem:[#allocation46_spill]] %s2988_s10 }
   0xb   :  { %3032 = sst [smem:[#allocation47_spill]] %s2989_s11 }
   0xc   :  { %3033 = sst [smem:[#allocation48_spill]] %s2990_s12 }
   0xd   :  { %17 = vsyncpa [#allocation6], 0 }
   0xe   :  { %19 = vsyncpa [#allocation6 + $0x1], 0 }
   0xf   :  { %20 = vsyncpa [#allocation9], 0 }
  0x10   :  { %22 = vsyncpa [#allocation9 + $0x1], 0 }
  0x11   :  { %23 = vsyncpa [#allocation12], 0 }
  0x12   :  { %25 = vsyncpa [#allocation12 + $0x1], 0 }
  0x13   :  { %26 = vsyncpa [#allocation15], 0 }
  0x14   :  { %27 = vsyncpa [#allocation7], 0 }
  0x15   :  { %29 = vsyncpa [#allocation7 + $0x1], 0  ;;  %s2348_s21 = smov 0   ;;  %s2350_s22 = smov 0  }
  0x16   :  { %s2352_s23 = smov 0   ;;  %s2354_s24 = smov 0  }
  0x17   :  { %s2356_s25 = smov 0   ;;  %s2358_s26 = smov 0  }
  0x18   :  { %s2360_s27 = smov 0   ;;  %s2362_s28 = smov 0  }
  0x19   :  { %s2364_s29 = smov 0   ;;  %s2366_s30 = smov 0  }
  0x1a   :  { %s2368_s13 = smov 0   ;;  %s2370_s14 = smov 0  }
  0x1b   :  { %s2372_s15 = smov 0   ;;  %s2374_s16 = smov 0  }
  0x1c LB: > { %3034 = sst [smem:[#allocation24_spill]] %s2207_s21  ;;  %s2419_s17 = sadd.s32 4294967295, %s2259_s16   ;;  %s2259_s16 = sphi %s2374_s16, %s35_s16   ;;  %s2255_s15 = sphi %s2372_s15, %s3127_s15   ;;  %s2251_s14 = sphi %s2370_s14, %s3126_s14   ;;  %s2247_s13 = sphi %s2368_s13, %s3125_s13   ;;  %s2243_s30 = sphi %s2366_s30, %s3124_s30   ;;  %s2239_s29 = sphi %s2364_s29, %s3123_s29   ;;  %s2235_s28 = sphi %s2362_s28, %s3122_s28   ;;  %s2231_s27 = sphi %s2360_s27, %s3121_s27   ;;  %s2227_s26 = sphi %s2358_s26, %s3120_s26   ;;  %s2223_s25 = sphi %s2356_s25, %s3119_s25   ;;  %s2219_s24 = sphi %s2354_s24, %s3115_s24   ;;  %s2215_s23 = sphi %s2352_s23, %s3118_s23   ;;  %s2211_s22 = sphi %s2350_s22, %s3114_s22   ;;  %s2207_s21 = sphi %s2348_s21, %s3113_s21  }
  0x1d   : > { %3035 = sst [smem:[#allocation25_spill]] %s2211_s22  ;;  %p1524_p0 = scmp.ge.s32.totalorder %s2259_s16, 1 }
  0x1e   : > { %3036 = sst [smem:[#allocation26_spill]] %s2215_s23  ;;  %p2995_p1 = scmp.eq.s32.totalorder %s2419_s17, 0 }
  0x1f   : > { %3037 = sst [smem:[#allocation27_spill]] %s2223_s25  ;;  %p354_p2 = scmp.lt.s32.totalorder %s2259_s16, 5 }
  0x20   : > { %3038 = sst [smem:[#allocation28_spill]] %s2231_s27  ;;  %s2261_s19 = smov [#allocation13]  }
  0x21   : > { %3039 = sst [smem:[#allocation29_spill]] %s2243_s30  ;;  %p2424_p3 = pnand %p1524_p0, %p354_p2 }
  0x22   : > { %3040 = sst [smem:[#allocation30_spill]] %s2247_s13  ;;  %s366_s20 = sshll.u32 %s2261_s19, 4  ;;  %s367_s20 = int_to_ptr.vmem [resolvable:$true] %s366_s20 }
  0x23   : > { %s3041_s18 = scalar_select %p2424_p3, 1, 0 }
  0x24   : > { %p1711_p4 = pneg %p2424_p3  ;;  %s2262_s11 = smov [#allocation14]  }
  0x25   : > { %3042 = sst [smem:[#allocation31_spill]] %s3041_s18  ;;  %s388_s13 = sshll.u32 %s2262_s11, 4  ;;  %s2436_s13 = int_to_ptr.vmem [resolvable:$true] %s388_s13 }
  0x26   : > { %p2432_p5 = pnand %p1711_p4, %p2995_p1  ;;  %s3044_s4 = sld [smem:[#allocation40_spill]] }
  0x28   : > { %s3043_s12 = scalar_select %p2432_p5, 1, 0 }
  0x29   : > { %p2446_p7 = pneg %p2432_p5 }
  0x2c   : > { %s1893_s7 = scalar_lea.hbm %s3044_s4, 256 }
  0x2d   : > { %p1894_p6 = scmp.ne.s32.totalorder %s3044_s4, %s1893_s7  ;;  %p1900_p10 = scmp.lt.u32.totalorder %s1893_s7, %s3044_s4 }
  0x2f   : > { %p1896_p8 = pnand %p2446_p7, %p1894_p6 }
  0x31   : > { %p1897_p9 = pneg %p1896_p8 }
  0x33   : > { %p1902_p11 = pnand %p1900_p10, %p1897_p9 }
  0x35   : > { %1905 = shalt.err (!%p1902_p11)
}
  0x36   : > { %s1906_s5 = scalar_lea.vmem %s367_s20, 256  ;;  %p1914_p2 = scmp.lt.s32.totalorder %s367_s20, %s367_s20 }
  0x37   : > { %p1907_p12 = scmp.ne.s32.totalorder %s367_s20, %s1906_s5  ;;  %p1915_p4 = scmp.lt.s32.totalorder %s1906_s5, %s1906_s5 }
  0x39   : > { %p1909_p13 = pnand %p1907_p12, %p2446_p7  ;;  %p1916_p1 = por %p1915_p4, %p1914_p2 }
  0x3b   : > { %p1910_p0 = pneg %p1909_p13 }
  0x3d   : > { %p1917_p3 = pnand %p1916_p1, %p1910_p0 }
  0x3f   : > { %1920 = shalt.err (!%p1917_p3)
}
  0x40   : > { %s2263_s6 = smov 64   ;;  %s2264_s10 = smov 4  }
  0x41   : > { %1714 = dma.hbm_to_vmem [thread:$0]  (!%p2432_p5), %s3044_s4, 256, %s367_s20, [#allocation12], %s2263_s6, %s2263_s6, %s2264_s10  }
  0x42   : > { %s3046_s8 = sld [smem:[#allocation44_spill]] }
  0x48   : > { %s1921_s3 = scalar_lea.hbm %s3046_s8, 256 }
  0x49   : > { %p1922_p6 = scmp.ne.s32.totalorder %s3046_s8, %s1921_s3  ;;  %p1928_p8 = scmp.lt.u32.totalorder %s1921_s3, %s3046_s8 }
  0x4b   : > { %p1924_p1 = pnand %p1922_p6, %p2446_p7 }
  0x4d   : > { %p1925_p3 = pneg %p1924_p1 }
  0x4f   : > { %p1930_p9 = pnand %p1928_p8, %p1925_p3 }
  0x51   : > { %1933 = shalt.err (!%p1930_p9)
}
  0x52   : > { %s1934_s20 = scalar_lea.vmem %s2436_s13, 256  ;;  %p1942_p13 = scmp.lt.s32.totalorder %s2436_s13, %s2436_s13 }
  0x53   : > { %p1935_p10 = scmp.ne.s32.totalorder %s2436_s13, %s1934_s20  ;;  %p1943_p0 = scmp.lt.s32.totalorder %s1934_s20, %s1934_s20 }
  0x55   : > { %p1937_p11 = pnand %p1935_p10, %p2446_p7  ;;  %p1944_p2 = por %p1943_p0, %p1942_p13 }
  0x57   : > { %p1938_p12 = pneg %p1937_p11 }
  0x59   : > { %p1945_p4 = pnand %p1944_p2, %p1938_p12 }
  0x5b   : > { %1948 = shalt.err (!%p1945_p4)
}
  0x5c   : > { %1717 = dma.hbm_to_vmem [thread:$0]  (!%p2432_p5), %s3046_s8, 256, %s2436_s13, [#allocation15], %s2263_s6, %s2263_s6, %s2264_s10  }
  0x5d   : > { %p3001_p6 = scmp.eq.s32.totalorder %s2259_s16, 0  ;;  %p89_p1 = scmp.ne.s32.totalorder %s2227_s26, %s2223_s25 }
  0x5e   : > { %p95_p3 = scmp.ne.s32.totalorder %s2223_s25, %s2219_s24  ;;  %p3000_p8 = scmp.lt.s32.totalorder %s2259_s16, 4 }
  0x5f   : > { %s3002_s23 = sand.u32 1, %s2259_s16   ;;  %p91_p9 = por %p89_p1, %p3001_p6 }
  0x60   : > { %p3047_p10 = scmp.eq.s32.totalorder %s2419_s17, 0  ;;  %s441_s7 = sand.u32 1, %s2227_s26  }
  0x61   : > { %s2502_s18 = sshll.u32 %s441_s7, 4  ;;  %s1579_s11 = sshll.u32 %s2255_s15, 8 }
  0x62   : > { %p2497_p11 = por %p95_p3, %p3047_p10  ;;  %s3050_s1 = sld [smem:[#allocation38_spill]] }
  0x63   : > { %s443_s24 = scalar_lea.vmem [#allocation8], %s2502_s18  ;;  %p2515_p12 = pnand %p3000_p8, %p91_p9 }
  0x64   : > { %s3048_s30 = scalar_select %p2497_p11, 1, 0 }
  0x65   : > { %s450_s5 = sshll.u32 %s443_s24, 4  ;;  %s2523_s3 = scalar_lea.sflag [#allocation9], %s3002_s23  ;;  %s2519_s5 = int_to_ptr.vmem [resolvable:$true] %s450_s5 }
  0x66   : > { %3049 = sst [smem:[#allocation32_spill]] %s3048_s30  ;;  %p3011_p0 = pneg %p2515_p12 }
  0x67   : > { %s3051_s20 = scalar_select %p2515_p12, 1, 0 }
  0x68   : > { %s2510_s10 = scalar_lea.hbm %s3050_s1, %s1579_s11  ;;  %s1954_s6 = scalar_lea.hbm %s3050_s1, 512 }
  0x69   : > { %3052 = sst [smem:[#allocation33_spill]] %s3051_s20  ;;  %s1949_s21 = scalar_lea.hbm %s2510_s10, 256 }
  0x6a   : > { %p1950_p13 = scmp.ne.s32.totalorder %s2510_s10, %s1949_s21  ;;  %p1955_p1 = scmp.lt.u32.totalorder %s2510_s10, %s3050_s1 }
  0x6b   : > { %p1956_p3 = scmp.lt.u32.totalorder %s1954_s6, %s1949_s21  ;;  %p1958_p10 = scmp.lt.u32.totalorder %s1949_s21, %s2510_s10 }
  0x6c   : > { %p1952_p2 = pnand %p3011_p0, %p1950_p13 }
  0x6d   : > { %p1957_p9 = por %p1956_p3, %p1955_p1 }
  0x6e   : > { %p1953_p4 = pneg %p1952_p2 }
  0x6f   : > { %p1959_p8 = por %p1958_p10, %p1957_p9 }
  0x71   : > { %p1960_p6 = pnand %p1959_p8, %p1953_p4 }
  0x73   : > { %1963 = shalt.err (!%p1960_p6)
}
  0x74   : > { %s1964_s23 = scalar_lea.vmem %s2519_s5, 256  ;;  %s2265_s7 = smov [#allocation8]  }
  0x75   : > { %p1965_p13 = scmp.ne.s32.totalorder %s2519_s5, %s1964_s23  ;;  %s1969_s13 = sshll.u32 %s2265_s7, 4  ;;  %s1970_s13 = int_to_ptr.vmem [resolvable:$false] %s1969_s13 }
  0x76   : > { %s1971_s22 = scalar_lea.vmem %s1970_s13, 512  ;;  %p1972_p5 = scmp.lt.s32.totalorder %s2519_s5, %s1970_s13 }
  0x77   : > { %p1967_p2 = pnand %p1965_p13, %p3011_p0  ;;  %p1973_p1 = scmp.lt.s32.totalorder %s1971_s22, %s1964_s23 }
  0x79   : > { %p1968_p11 = pneg %p1967_p2  ;;  %p1974_p3 = por %p1973_p1, %p1972_p5 }
  0x7b   : > { %p1975_p9 = pnand %p1974_p3, %p1968_p11 }
  0x7d   : > { %1978 = shalt.err (!%p1975_p9)
}
  0x7e   : > { %s3012_s21 = smov 128   ;;  %s3013_s6 = smov 8  }
  0x7f   : > { %1727 = dma.hbm_to_vmem [thread:$0]  (!%p2515_p12), %s2510_s10, 256, %s2519_s5, %s2523_s3, %s3012_s21, %s3012_s21, %s3013_s6  }
  0x80   : > { %s2559_s7 = scalar_lea.hbm %s2980_s2, %s1579_s11  ;;  %s464_s13 = scalar_lea.vmem [#allocation10], %s2502_s18 }
  0x81   : > { %s471_s22 = sshll.u32 %s464_s13, 4  ;;  %s2268_s1 = smov [#allocation16]   ;;  %s2562_s22 = int_to_ptr.vmem [resolvable:$true] %s471_s22 }
  0x82   : > { %s402_s4 = sshll.u32 %s2268_s1, 4  ;;  %s3053_s9 = sld [smem:[#allocation45_spill]]  ;;  %s403_s4 = int_to_ptr.vmem [resolvable:$true] %s402_s4 }
  0x88   : > { %s1979_s25 = scalar_lea.hbm %s3053_s9, 16 }
  0x89   : > { %p1980_p5 = scmp.ne.s32.totalorder %s3053_s9, %s1979_s25  ;;  %p1986_p11 = scmp.lt.u32.totalorder %s1979_s25, %s3053_s9 }
  0x8b   : > { %p1982_p6 = pnand %p1980_p5, %p2446_p7 }
  0x8d   : > { %p1983_p8 = pneg %p1982_p6 }
  0x8f   : > { %p1988_p4 = pnand %p1986_p11, %p1983_p8 }
  0x91   : > { %1991 = shalt.err (!%p1988_p4)
}
  0x92   : > { %s1992_s18 = scalar_lea.vmem %s403_s4, 16  ;;  %s1999_s1 = scalar_lea.vmem %s403_s4, 32 }
  0x93   : > { %p1993_p10 = scmp.ne.s32.totalorder %s403_s4, %s1992_s18  ;;  %p2000_p1 = scmp.lt.s32.totalorder %s403_s4, %s403_s4 }
  0x94   : > { %p2001_p3 = scmp.lt.s32.totalorder %s1999_s1, %s1992_s18 }
  0x95   : > { %p1995_p13 = pnand %p1993_p10, %p2446_p7 }
  0x96   : > { %p2002_p9 = por %p2001_p3, %p2000_p1 }
  0x97   : > { %p1996_p2 = pneg %p1995_p13 }
  0x99   : > { %p2003_p0 = pnand %p2002_p9, %p1996_p2 }
  0x9b   : > { %2006 = shalt.err (!%p2003_p0)
}
  0x9c   : > { %p3054_p5 = scmp.ne.s32.totalorder %s3043_s12, 0  ;;  %s1523_s12 = sadd.s32 4294967294, %s2259_s16  }
  0x9d   : > { %s44_s25 = sadd.s32 1, %s2251_s14  ;;  %s47_s19 = sadd.s32 1, %s2255_s15 }
  0x9e   : > { %1720 = dma.hbm_to_vmem [thread:$0]  (!%p3054_p5), %s3053_s9, 16, %s403_s4, [#allocation15]  }
  0x9f   : > { %p45_p7 = scmp.ge.s32.totalorder %s44_s25, 2  ;;  %s56_s30 = sadd.s32 1, %s2239_s29 }
  0xa0   : > { %p63_p0 = scmp.ne.s32.totalorder %s2239_s29, %s2235_s28  ;;  %p69_p6 = scmp.ne.s32.totalorder %s2235_s28, %s2231_s27 }
  0xa1   : > { %s3129_s25 = smov (%p45_p7, %s44_s25), 0  ;;  %s3131_s19 = smov (!%p45_p7, %s47_s19), %s2255_s15 }
  0xa2   : > { %3055 = sst [smem:[#allocation34_spill]] %s3129_s25  ;;  %s2595_s5 = ssub.s32 %s2251_s14, %s3129_s25 }
  0xa3   : > { %p3056_p8 = scmp.eq.s32.totalorder %s2259_s16, 0  ;;  %p49_p4 = scmp.ge.s32.totalorder %s3131_s19, 2 }
  0xa4   : > { %p3058_p10 = scmp.eq.s32.totalorder %s2419_s17, 0  ;;  %p341_p1 = scmp.eq.s32.totalorder %s2419_s17, 3 }
  0xa5   : > { %p2599_p11 = por %p3056_p8, %p63_p0  ;;  %s3133_s19 = smov (%p49_p4, %s3131_s19), 0 }
  0xa6   : > { %p2608_p13 = por %p3058_p10, %p69_p6  ;;  %3061 = sst [smem:[#allocation36_spill]] %s3133_s19 }
  0xa7   : > { %p2616_p3 = por %p341_p1, %p63_p0  ;;  %p347_p9 = scmp.eq.s32.totalorder %s1523_s12, 3 }
  0xa8   : > { %s3059_s20 = scalar_select %p2608_p13, 1, 0 }
  0xa9   : > { %s3062_s24 = scalar_select %p2616_p3, 1, 0 }
  0xaa   : > { %3060 = sst [smem:[#allocation35_spill]] %s3059_s20  ;;  %s51_s23 = ssub.s32 %s2255_s15, %s3133_s19 }
  0xab   : > { %s419_s13 = sand.u32 1, %s2239_s29   ;;  %s53_s11 = sor.u32 %s2595_s5, %s51_s23 }
  0xac   : > { %p80_p5 = scmp.eq.s32.totalorder %s51_s23, 0  ;;  %p54_p7 = scmp.eq.s32.totalorder %s53_s11, 0 }
  0xad   : > { %p2627_p8 = por %p347_p9, %p69_p6  ;;  %s3066_s1 = sadd.s32 1, %s2227_s26 }
  0xae   : > { %s2634_s0 = scalar_select %p80_p5, %s2227_s26, %s3066_s1  }
  0xaf   : > { %s3064_s18 = scalar_select %p2627_p8, 1, 0 }
  0xb0   : > { %s2637_s8 = scalar_select %p54_p7, %s2239_s29, %s56_s30  }
  0xb1   : > { %3065 = sst [smem:[#allocation33_spill]] %s3064_s18  ;;  %s1529_s12 = sshll.u32 %s419_s13, 3 }
  0xb2   : > { %s1530_s21 = sshll.u32 %s2255_s15, 1  ;;  %s423_s9 = scalar_lea.vmem [#allocation5], %s1529_s12 }
  0xb3   : > { %s428_s6 = sadd.s32 %s2251_s14, %s1530_s21  ;;  %s432_s23 = sshll.u32 %s423_s9, 4  ;;  %s2643_s23 = int_to_ptr.vmem [resolvable:$true] %s432_s23 }
  0xb4   : > { %s1531_s19 = sshll.u32 %s428_s6, 7  ;;  %s3067_s27 = sld [smem:[#allocation37_spill]] }
  0xb5   : > { %p3069_p0 = scmp.lt.s32.totalorder %s2259_s16, 4  ;;  %s2007_s1 = scalar_lea.hbm %s2559_s7, 256 }
  0xb6   : > { %p2008_p4 = scmp.ne.s32.totalorder %s2559_s7, %s2007_s1  ;;  %p3071_p10 = pneg %p2515_p12 }
  0xb7   : > { %p2654_p6 = pnand %p3069_p0, %p2599_p11  ;;  %s2012_s6 = scalar_lea.hbm %s2980_s2, 512 }
  0xb8   : > { %p2010_p1 = pnand %p2008_p4, %p3071_p10  ;;  %p2013_p5 = scmp.lt.u32.totalorder %s2559_s7, %s2980_s2 }
  0xb9   : > { %p2014_p7 = scmp.lt.u32.totalorder %s2012_s6, %s2007_s1  ;;  %p2016_p11 = scmp.lt.u32.totalorder %s2007_s1, %s2559_s7 }
  0xba   : > { %s3068_s20 = smov %s3067_s27  ;;  %s2648_s18 = scalar_lea.hbm %s3067_s27, %s1531_s19 }
  0xbb   : > { %p2011_p9 = pneg %p2010_p1  ;;  %p2015_p2 = por %p2014_p7, %p2013_p5 }
  0xbd   : > { %p2017_p0 = por %p2016_p11, %p2015_p2 }
  0xbf   : > { %p2018_p8 = pnand %p2017_p0, %p2011_p9 }
  0xc1   : > { %2021 = shalt.err (!%p2018_p8)
}
  0xc2   : > { %s2022_s27 = scalar_lea.vmem %s2562_s22, 256  ;;  %s2269_s19 = smov [#allocation10]  }
  0xc3   : > { %p2023_p4 = scmp.ne.s32.totalorder %s2562_s22, %s2022_s27  ;;  %s2027_s4 = sshll.u32 %s2269_s19, 4  ;;  %s2028_s4 = int_to_ptr.vmem [resolvable:$false] %s2027_s4 }
  0xc4   : > { %s2029_s11 = scalar_lea.vmem %s2028_s4, 512  ;;  %p2030_p13 = scmp.lt.s32.totalorder %s2562_s22, %s2028_s4 }
  0xc5   : > { %p2025_p1 = pnand %p2023_p4, %p3071_p10  ;;  %p2031_p5 = scmp.lt.s32.totalorder %s2029_s11, %s2022_s27 }
  0xc7   : > { %p2026_p3 = pneg %p2025_p1  ;;  %p2032_p7 = por %p2031_p5, %p2030_p13 }
  0xc9   : > { %p2033_p2 = pnand %p2032_p7, %p2026_p3 }
  0xcb   : > { %2036 = shalt.err (!%p2033_p2)
}
  0xcc   : > { %s3072_s1 = smov 8   ;;  %s3073_s9 = smov 128  }
  0xcd   : > { %1730 = dma.hbm_to_vmem [thread:$0]  (!%p2515_p12), %s2559_s7, 256, %s2562_s22, %s2523_s3, %s3073_s9, %s3073_s9, %s3072_s1  }
  0xce   : > { %s420_s21 = scalar_lea.sflag [#allocation6], %s419_s13  ;;  %s2037_s6 = scalar_lea.hbm %s2648_s18, 128 }
  0xcf   : > { %p2038_p13 = scmp.ne.s32.totalorder %s2648_s18, %s2037_s6  ;;  %p2039_p3 = pneg %p2654_p6 }
  0xd0   : > { %s2042_s25 = scalar_lea.hbm %s3068_s20, 512  ;;  %p2043_p11 = scmp.lt.u32.totalorder %s2648_s18, %s3068_s20 }
  0xd1   : > { %p2040_p8 = pnand %p2039_p3, %p2038_p13  ;;  %p2044_p0 = scmp.lt.u32.totalorder %s2042_s25, %s2037_s6 }
  0xd2   : > { %p2046_p4 = scmp.lt.u32.totalorder %s2037_s6, %s2648_s18 }
  0xd3   : > { %p2041_p9 = pneg %p2040_p8  ;;  %p2045_p12 = por %p2044_p0, %p2043_p11 }
  0xd5   : > { %p2047_p10 = por %p2046_p4, %p2045_p12 }
  0xd7   : > { %p2048_p1 = pnand %p2047_p10, %p2041_p9 }
  0xd9   : > { %2051 = shalt.err (!%p2048_p1)
}
  0xda   : > { %s2052_s3 = scalar_lea.vmem %s2643_s23, 128  ;;  %s2270_s7 = smov [#allocation5]  }
  0xdb   : > { %p2053_p5 = scmp.ne.s32.totalorder %s2643_s23, %s2052_s3  ;;  %s2057_s22 = sshll.u32 %s2270_s7, 4  ;;  %s2058_s22 = int_to_ptr.vmem [resolvable:$false] %s2057_s22 }
  0xdc   : > { %s2059_s13 = scalar_lea.vmem %s2058_s22, 256  ;;  %p2060_p13 = scmp.lt.s32.totalorder %s2643_s23, %s2058_s22 }
  0xdd   : > { %p2055_p7 = pnand %p2053_p5, %p2039_p3  ;;  %p2061_p8 = scmp.lt.s32.totalorder %s2059_s13, %s2052_s3 }
  0xdf   : > { %p2056_p2 = pneg %p2055_p7  ;;  %p2062_p11 = por %p2061_p8, %p2060_p13 }
  0xe1   : > { %p2063_p0 = pnand %p2062_p11, %p2056_p2 }
  0xe3   : > { %2066 = shalt.err (!%p2063_p0)
}
  0xe4   : > { %s3074_s4 = sld [smem:[#allocation26_spill]]  ;;  %s3075_s11 = sld [smem:[#allocation25_spill]] }
  0xe5   : > { %s3076_s1 = sld [smem:[#allocation24_spill]]  ;;  %p3077_p3 = scmp.eq.s32.totalorder %s2595_s5, 0 }
  0xe6   : > { %1724 = dma.hbm_to_vmem [thread:$0]  (!%p2654_p6), %s2648_s18, 128, %s2643_s23, %s420_s21  }
  0xe7   : > { %p3078_p4 = scmp.eq.s32.totalorder %s2259_s16, 0  ;;  %p3079_p1 = scmp.eq.s32.totalorder %s2419_s17, 0 }
  0xe8   : > { %s1539_s25 = sshll.u32 %s2251_s14, 7  ;;  %s3081_s3 = sld [smem:[#allocation39_spill]] }
  0xe9   : > { %p3082_p6 = scmp.lt.s32.totalorder %s2259_s16, 4  ;;  %s3084_s7 = sand.u32 1, %s2259_s16  }
  0xea   : > { %s134_s9 = sadd.s32 1, %s3074_s4  ;;  %p141_p9 = scmp.ne.s32.totalorder %s3074_s4, %s3075_s11 }
  0xeb   : > { %s2716_s6 = scalar_select %p3077_p3, %s3074_s4, %s134_s9  }
  0xec   : > { %p147_p12 = scmp.ne.s32.totalorder %s3075_s11, %s3076_s1  ;;  %s483_s30 = sand.u32 1, %s3074_s4  }
  0xed   : > { %p143_p10 = por %p141_p9, %p3078_p4  ;;  %s1538_s12 = sshll.u32 %s483_s30, 3 }
  0xee   : > { %p2727_p5 = por %p147_p12, %p3079_p1  ;;  %s2735_s18 = scalar_lea.hbm %s3081_s3, %s1539_s25 }
  0xef   : > { %s485_s5 = scalar_lea.vmem [#allocation11], %s1538_s12  ;;  %p2739_p7 = pnand %p3082_p6, %p143_p10 }
  0xf0   : > { %s492_s23 = sshll.u32 %s485_s5, 4  ;;  %s482_s22 = scalar_lea.sflag [#allocation12], %s3084_s7  ;;  %s2743_s23 = int_to_ptr.vmem [resolvable:$true] %s492_s23 }
  0xf1   : > { %s2067_s13 = scalar_lea.hbm %s2735_s18, 128  ;;  %p2069_p13 = pneg %p2739_p7 }
  0xf2   : > { %p2068_p2 = scmp.ne.s32.totalorder %s2735_s18, %s2067_s13  ;;  %s2072_s1 = scalar_lea.hbm %s3081_s3, 256 }
  0xf3   : > { %p2073_p0 = scmp.lt.u32.totalorder %s2735_s18, %s3081_s3  ;;  %p2074_p3 = scmp.lt.u32.totalorder %s2072_s1, %s2067_s13 }
  0xf4   : > { %p2070_p8 = pnand %p2069_p13, %p2068_p2  ;;  %p2076_p12 = scmp.lt.u32.totalorder %s2067_s13, %s2735_s18 }
  0xf5   : > { %p2075_p9 = por %p2074_p3, %p2073_p0 }
  0xf6   : > { %p2071_p11 = pneg %p2070_p8 }
  0xf7   : > { %p2077_p4 = por %p2076_p12, %p2075_p9 }
  0xf9   : > { %p2078_p10 = pnand %p2077_p4, %p2071_p11 }
  0xfb   : > { %2081 = shalt.err (!%p2078_p10)
}
  0xfc   : > { %s2082_s12 = scalar_lea.vmem %s2743_s23, 128  ;;  %s2271_s25 = smov [#allocation11]  }
  0xfd   : > { %p2083_p1 = scmp.ne.s32.totalorder %s2743_s23, %s2082_s12  ;;  %s2087_s27 = sshll.u32 %s2271_s25, 4  ;;  %s2088_s27 = int_to_ptr.vmem [resolvable:$false] %s2087_s27 }
  0xfe   : > { %s2089_s19 = scalar_lea.vmem %s2088_s27, 256  ;;  %p2090_p8 = scmp.lt.s32.totalorder %s2743_s23, %s2088_s27 }
  0xff   : > { %p2085_p6 = pnand %p2083_p1, %p2069_p13  ;;  %p2091_p0 = scmp.lt.s32.totalorder %s2089_s19, %s2082_s12 }
 0x101   : > { %p2086_p2 = pneg %p2085_p6  ;;  %p2092_p3 = por %p2091_p0, %p2090_p8 }
 0x103   : > { %p2093_p9 = pnand %p2092_p3, %p2086_p2 }
 0x105   : > { %2096 = shalt.err (!%p2093_p9)
}
 0x106   : > { %1733 = dma.hbm_to_vmem [thread:$0]  (!%p2739_p7), %s2735_s18, 128, %s2743_s23, %s482_s22  }
 0x107   : > { %s3085_s5 = sld [smem:[#allocation31_spill]] }
 0x10d   : > { %p3086_p11 = scmp.ne.s32.totalorder %s3085_s5, 0 }
 0x10e   : > { %s3087_s7 = sld [smem:[#allocation35_spill]] (!%p3086_p11)  ;;  %s2775_s13 = sand.u32 (!%p3086_p11), 1, %s2235_s28  }
 0x10f   : > { %501 = sbr.rel (%p3086_p11) target bundleno = 1724 (0x6bc), region = 68  ;;  %s1541_s4 = sshll.u32 (!%p3086_p11), %s2775_s13, 3 }
 0x110   : > { %s504_s11 = scalar_lea.sflag (!%p3086_p11), [#allocation6], %s2775_s13  ;;  %s2779_s1 = scalar_lea.vmem (!%p3086_p11), [#allocation5], %s1541_s4 }
 0x114   : > { %p3088_p13 = scmp.ne.s32.totalorder (!%p3086_p11), %s3087_s7, 0 }
 0x116   : > { %2182 = dma.done.wait (%p3088_p13), %s504_s11, 128  }
 0x117   : > { %2184 = vsyncadd (%p3088_p13), %s504_s11, 4294967168  ;;  %s3089_s18 = sld [smem:[#allocation27_spill]]  ;;  %s512_s21 = sand.u32 1, %s2419_s17  }
 0x118   : > { %s3090_s23 = sld [smem:[#allocation32_spill]]  ;;  %s513_s30 = scalar_lea.sflag [#allocation9], %s512_s21 }
 0x11d   : > { %s514_s22 = sand.u32 1, %s3089_s18  }
 0x11e   : > { %s2787_s9 = sshll.u32 %s514_s22, 4  ;;  %p3091_p7 = scmp.ne.s32.totalorder %s3090_s23, 0 }
 0x11f   : > { %s516_s12 = scalar_lea.vmem [#allocation8], %s2787_s9 }
 0x120   : > { %2186 = dma.done.wait (%p3091_p7), %s513_s30, 512  }
 0x121   : > { %2188 = vsyncadd (%p3091_p7), %s513_s30, 4294966784  ;;  %s3092_s25 = sld [smem:[#allocation25_spill]]  ;;  %s525_s5 = scalar_lea.vmem [#allocation10], %s2787_s9 }
 0x122   : > { %s531_s7 = scalar_lea.sflag [#allocation12], %s512_s21 }
 0x127   : > { %s532_s27 = sand.u32 1, %s3092_s25  }
 0x128   : > { %s2795_s19 = sshll.u32 %s532_s27, 3 }
 0x129   : > { %s534_s11 = scalar_lea.vmem [#allocation11], %s2795_s19 }
 0x12a   : > { %2190 = dma.done.wait (%p2727_p5), %s531_s7, 128  }
 0x12b   : > { %2192 = vsyncadd (%p2727_p5), %s531_s7, 4294967168  ;;  %p3093_p12 = scmp.eq.s32.totalorder %s2419_s17, 0 }
 0x12d   : > { %2194 = dma.done.wait (%p3093_p12), [#allocation12], 256   ;;  %p3094_p4 = pmov %p3093_p12 }
 0x12f   : > { %2196 = vsyncadd (%p3094_p4), [#allocation12], 4294967040  ;;  %p3095_p10 = pmov %p3094_p4 }
 0x130   : > { %p3096_p1 = pmov %p3094_p4 }
 0x131   : > { %2198 = dma.done.wait (%p3095_p10), [#allocation15], 272  }
 0x132   : > { %2200 = vsyncadd (%p3096_p1), [#allocation15], 4294967024  ;;  %s2811_s18 = scalar_lea.vmem [#allocation17], %s1541_s4  ;;  %s3097_s23 = sld [smem:[#allocation29_spill]] }
 0x138   : > { %p1549_p6 = scmp.ne.s32.totalorder %s3097_s23, 0 }
 0x139   : > { %s3098_s22 = sld [smem:[#allocation42_spill]] (!%p1549_p6)  ;;  %v2272_v1 = vmov (!%p1549_p6), 0.0   ;;  %v1876_v2 = vld [vmem:[#allocation14] sm:$0xff] (!%p1549_p6)   ;;  %vm2273_vm0 = vmmov (!%p1549_p6), 0   ;;  %v1878_v4 = vld [vmem:[#allocation14 + $0x8] sm:$0xff] (!%p1549_p6)   ;;  %vm636_vm1 = vcmask (!%p1549_p6), 261120  }
 0x13a   : > { %606 = sbr.rel (%p1549_p6) target bundleno = 546 (0x222), region = 100  ;;  %1609 = vmatprep.subr.bf16.mxu0 (!%p1549_p6), %v2272_v1  ;;  %1617 = vmatprep.subr.bf16.mxu1 (!%p1549_p6), %v2272_v1  ;;  %v607_v5 = vld [vmem:[%s516_s12] sm:$0xff] (!%p1549_p6)  ;;  %v608_v6 = vld [vmem:[%s516_s12 + $0x8] sm:$0xff] (!%p1549_p6)  ;;  %s3100_s27 = sld [smem:[#allocation43_spill]] (!%p1549_p6) }
 0x13b   : > { %1613 = vmatprep.mubr.msk.bf16.mxu0 (!%p1549_p6), %vm2273_vm0, %v2272_v1  ;;  %1618 = vmatpush3.bf16.msra.mxu1 (!%p1549_p6), %v1876_v2  ;;  %v610_v7 = vld [vmem:[%s525_s5] sm:$0xff] (!%p1549_p6)  ;;  %v609_v8 = vpack.c.bf16 (!%p1549_p6), %v608_v6, %v607_v5  ;;  %v611_v9 = vld [vmem:[%s525_s5 + $0x8] sm:$0xff] (!%p1549_p6) }
 0x13c   : > { %1619 = vmatprep.subr.bf16.mxu1 (!%p1549_p6), %v2272_v1  ;;  %1621 = vmatprep.mubr.msk.bf16.mxu1 (!%p1549_p6), %vm2273_vm0, %v2272_v1  ;;  %v612_v10 = vpack.c.bf16 (!%p1549_p6), %v611_v9, %v610_v7  ;;  %v1554_v13 = vld [vmem:[#allocation16] ss:$0 sm:$0xff] (!%p1549_p6) }
 0x13f   : > { %s3099_s7 = smov (!%p1549_p6), %s3098_s22  ;;  %v1875_v0 = vld [vmem:[%s3098_s22] sm:$0xff] (!%p1549_p6)   ;;  %1620 = vmatpush3.bf16.msra.mxu1 (!%p1549_p6), %v1878_v4 }
 0x140   : > { %1610 = vmatpush3.bf16.msra.mxu0 (!%p1549_p6), %v1875_v0  ;;  %v1877_v3 = vld [vmem:[%s3099_s7 + $0x8] sm:$0xff] (!%p1549_p6)   ;;  %v1550_v11 = vld [vmem:[%s3100_s27] ss:$0 sm:$0xff] (!%p1549_p6) }
 0x141   : > { %1611 = vmatprep.subr.bf16.mxu0 %v2272_v1 }
 0x142   : > { %1622 = vmatmul.mubr.msk.bf16.vlgmr.msra.gmra.mrb[0].mxu1 %vm636_vm1, %v612_v10 }
 0x144   : > { %1612 = vmatpush3.bf16.msra.mxu0 %v1877_v3 }
 0x147   : > { %1614 = vmatmul.mubr.msk.bf16.vlgmr.msra.gmra.mrb[0].mxu0 %vm636_vm1, %v609_v8 }
 0x215   : > { %v743_v14 = vpop.f32.mrb[0].mxu1 }
 0x216   : > { %v1623_v16 = vpop.f32.mrb[1].mxu1  ;;  %v744_v22 = vadd.f32 %v1554_v13, %v743_v14 }
 0x217   : > { %v746_v20 = vpop.f32.mrb[2].mxu1 }
 0x218   : > { %v747_v23 = vadd.f32 %v1554_v13, %v746_v20  ;;  %v1624_v24 = vpop.f32.mrb[3].mxu1 }
 0x21a   : > { %v674_v12 = vpop.f32.mrb[0].mxu0  ;;  %v750_v26 = vpack.c.bf16 %v747_v23, %v744_v22 }
 0x21b   : > { %v1615_v15 = vpop.f32.mrb[1].mxu0  ;;  %v675_v18 = vadd.f32 %v1550_v11, %v674_v12 }
 0x21c   : > { %v677_v17 = vpop.f32.mrb[2].mxu0  ;;  %751 = vst.msk [vmem:[#allocation3] sm:$0xff] %vm636_vm1, %v750_v26 }
 0x21d   : > { %v678_v19 = vadd.f32 %v1550_v11, %v677_v17  ;;  %v1616_v21 = vpop.f32.mrb[3].mxu0 }
 0x21f   : > { %v681_v25 = vpack.c.bf16 %v678_v19, %v675_v18 }
 0x221   : > { %682 = vst.msk [vmem:[#allocation2] sm:$0xff] %vm636_vm1, %v681_v25 }
 0x222 PF: > { %v1879_v27 = vld [vmem:[#allocation13] sm:$0xff]   ;;  %v2274_v28 = vmov 0.0   ;;  %v1880_v29 = vld [vmem:[#allocation13 + $0x8] sm:$0xff]   ;;  %vm2275_vm2 = vmmov 0   ;;  %vm826_vm3 = vcmask 64512   ;;  %s2276_s9 = smov 120  }
 0x223   : > { %1625 = vmatprep.subr.bf16.mxu0 %v2274_v28  ;;  %1633 = vmatprep.subr.bf16.mxu1 %v2274_v28  ;;  %v752_v30 = vld [vmem:[%s2779_s1] sm:$0xff]  ;;  %vm777_vm4 = vcmask 261120   ;;  %s2277_s12 = smov 112   ;;  %s3101_s23 = sld [smem:[#allocation41_spill]]  ;;  %v823_v45 = vld [vmem:[#allocation3] sm:$0xff]  ;;  %vm1050_vm6 = vcmask 130048  }
 0x224   : > { %1626 = vmatpush3.bf16.msra.mxu0 %v1879_v27  ;;  %1629 = vmatprep.mubr.msk.bf16.mxu0 %vm2275_vm2, %v2274_v28  ;;  %v753_v33 = vpack.c.bf16 %v752_v30, %v752_v30  ;;  %s2278_s21 = smov 104   ;;  %v824_v56 = vld [vmem:[%s534_s11] sm:$0xff]  ;;  %s3102_s10 = sld [smem:[#allocation46_spill]]  ;;  %vm1148_vm7 = vcmask 130112   ;;  %vm1202_vm8 = vcmask 195712   ;;  %vm1256_vm9 = vcmask 261312  }
 0x225   : > { %1627 = vmatprep.subr.bf16.mxu0 %v2274_v28  ;;  %1635 = vmatprep.mubr.msk.bf16.mxu1 %vm2275_vm2, %v2274_v28  ;;  %vm825_vm5 = vcmp.eq.f32.partialorder %v824_v56, 0.0  ;;  %s2279_s25 = smov 8   ;;  %s2280_s17 = smov 16  }
 0x226   : > { %s2281_s4 = smov 24   ;;  %s3103_s27 = sld [smem:[#allocation30_spill]] }
 0x227   : > { %s1343_s11 = sshll.u32 %s2811_s18, 4  ;;  %p3108_p2 = scmp.ne.s32.totalorder %s3062_s24, 0  ;;  %s2900_s11 = int_to_ptr.vmem [resolvable:$true] %s1343_s11 }
 0x228   : > { %v822_v31 = vld [vmem:[#allocation2] sm:$0xff]  ;;  %1628 = vmatpush3.bf16.msra.mxu0 %v1880_v29 }
 0x229   : > { %878 = vrot.lane.b32.xlu0 %v822_v31, %s2276_s9  ;;  %v831_v32 = vsel %vm826_vm3, %v822_v31, 0  ;;  %1639 = vmatprep.subr.bf16.mxu0 %v2274_v28  ;;  %v1558_v36 = vld [vmem:[%s3101_s23] ss:$0 sm:$0xff] }
 0x22a   : > { %1634 = vmatpush3.bf16.xpose.msra.mxu1 %v831_v32 }
 0x22b   : > { %1645 = vmatprep.subr.bf16.mxu1 %v2274_v28  ;;  %1630 = vmatmul.mubr.msk.bf16.vlgmr.msra.gmra.mrb[0].mxu0 %vm777_vm4, %v753_v33 }
 0x22c   : > { %1641 = vmatprep.mubr.msk.bf16.mxu0 %vm2275_vm2, %v2274_v28 }
 0x22d   : > { %929 = vrot.lane.b32.xlu0 %v822_v31, %s2277_s12 }
 0x29b   : > { %v879_v34 = vpop.permute.xlu0 %878 }
 0x29c   : > { %v884_v35 = vsel %vm826_vm3, %v879_v34, 0 }
 0x29d   : > { %1640 = vmatpush3.bf16.xpose.msra.mxu0 %v884_v35 }
 0x29e   : > { %1651 = vmatprep.subr.bf16.mxu0 %v2274_v28 }
 0x29f   : > { %v930_v40 = vpop.permute.xlu0 %929 }
 0x2a0   : > { %v935_v44 = vsel %vm826_vm3, %v930_v40, 0  ;;  %v1882_v40 = vld [vmem:[%s3102_s10 + $0x8] sm:$0xff]  }
 0x2fe   : > { %v815_v37 = vpop.f32.mrb[0].mxu0 }
 0x2ff   : > { %v816_v38 = vadd.f32 %v1558_v36, %v815_v37  ;;  %v1631_v39 = vpop.f32.mrb[1].mxu0 }
 0x300   : > { %v818_v41 = vpop.f32.mrb[2].mxu0  ;;  %v1881_v39 = vld [vmem:[%s3102_s10] sm:$0xff]  }
 0x301   : > { %v821_v42 = vpack.c.bf16 %v816_v38, %v816_v38  ;;  %v1632_v43 = vpop.f32.mrb[3].mxu0 }
 0x303   : > { %927 = vrot.lane.b32.xlu0 %v821_v42, %s2277_s12  ;;  %875 = vrot.lane.b32.xlu1 %v821_v42, %s2276_s9 }
 0x304   : > { %1636 = vmatmul.mubr.msk.bf16.vlgmr.msra.gmra.mrb[0].mxu1 %vm826_vm3, %v821_v42 }
 0x305   : > { %1646 = vmatpush3.bf16.xpose.msra.mxu1 %v935_v44  ;;  %1647 = vmatprep.mubr.msk.bf16.mxu1 %vm2275_vm2, %v2274_v28 }
 0x306   : > { %1657 = vmatprep.subr.bf16.mxu1 %v2274_v28 }
 0x307   : > { %980 = vrot.lane.b32.xlu1 %v822_v31, %s2278_s21  ;;  %1098 = vrot.lane.b32.xlu0 %v823_v45, %s2276_s9  ;;  %s3104_s9 = sld [smem:[#allocation29_spill]] }
 0x30b   : > { %978 = vrot.lane.b32.xlu1 %v821_v42, %s2278_s21  ;;  %1206 = vrot.lane.b32.xlu0 %v823_v45, %s2278_s21  ;;  %s3105_s21 = sld [smem:[#allocation47_spill]] }
 0x30f   : > { %1152 = vrot.lane.b32.xlu1 %v823_v45, %s2277_s12  ;;  %s1575_s12 = sshll.u32 %s3103_s27, 1  ;;  %s1328_s27 = scalar_lea.sflag [#allocation7], %s2775_s13 }
 0x310   : > { %s1339_s1 = sadd.s32 %s3104_s9, %s1575_s12  ;;  %s2097_s9 = scalar_lea.vmem %s2900_s11, 128 }
 0x311   : > { %s1576_s19 = sshll.u32 %s1339_s1, 7  ;;  %p2098_p5 = scmp.ne.s32.totalorder %s2900_s11, %s2097_s9 }
 0x312   : > { %s2282_s12 = smov [#allocation17]  }
 0x313   : > { %p2099_p8 = pnand %p2098_p5, %p3108_p2  ;;  %s2101_s1 = sshll.u32 %s2282_s12, 4  ;;  %s2102_s1 = int_to_ptr.vmem [resolvable:$false] %s2101_s1 }
 0x314   : > { %s2103_s5 = scalar_lea.vmem %s2102_s1, 256  ;;  %p2104_p3 = scmp.lt.s32.totalorder %s2900_s11, %s2102_s1 }
 0x315   : > { %p2100_p0 = pneg %p2099_p8  ;;  %p2105_p9 = scmp.lt.s32.totalorder %s2103_s5, %s2097_s9 }
 0x317   : > { %p2106_p11 = por %p2105_p9, %p2104_p3 }
 0x319   : > { %p2107_p13 = pnand %p2106_p11, %p2100_p0 }
 0x375   : > { %v928_v46 = vpop.permute.xlu0 %927  ;;  %v876_v47 = vpop.permute.xlu1 %875 }
 0x376   : > { %1642 = vmatmul.mubr.msk.bf16.vlgmr.msra.gmra.mrb[4].mxu0 %vm826_vm3, %v876_v47  ;;  %1648 = vmatmul.mubr.msk.bf16.vlgmr.msra.gmra.mrb[4].mxu1 %vm826_vm3, %v928_v46 }
 0x377   : > { %1653 = vmatprep.mubr.msk.bf16.mxu0 %vm2275_vm2, %v2274_v28  ;;  %1658 = vmatpush3.bf16.msra.mxu1 %v823_v45 }
 0x378   : > { %1659 = vmatprep.mubr.msk.bf16.mxu1 %vm2275_vm2, %v2274_v28  ;;  %1669 = vmatprep.subr.bf16.mxu1 %v2274_v28 }
 0x379   : > { %v981_v48 = vpop.permute.xlu1 %980  ;;  %v1099_v55 = vpop.permute.xlu0 %1098 }
 0x37a   : > { %v986_v49 = vsel %vm826_vm3, %v981_v48, 0 }
 0x37b   : > { %1652 = vmatpush3.bf16.xpose.msra.mxu0 %v986_v49 }
 0x37c   : > { %1663 = vmatprep.subr.bf16.mxu0 %v2274_v28 }
 0x37d   : > { %v979_v50 = vpop.permute.xlu1 %978  ;;  %v1207_v36 = vpop.permute.xlu0 %1206 }
 0x381   : > { %v1153_v33 = vpop.permute.xlu1 %1152 }
 0x382   : > { %1654 = vmatmul.mubr.msk.bf16.vlgmr.msra.gmra.mrb[8].mxu0 %vm826_vm3, %v979_v50 }
 0x383   : > { %1665 = vmatprep.mubr.msk.bf16.mxu0 %vm2275_vm2, %v2274_v28  ;;  %1664 = vmatpush3.bf16.msra.mxu0 %v1099_v55 }
 0x384   : > { %1675 = vmatprep.subr.bf16.mxu0 %v2274_v28 }
 0x3d7   : > { %v867_v51 = vpop.f32.mrb[0].mxu1 }
 0x3d8   : > { %v1637_v52 = vpop.f32.mrb[1].mxu1  ;;  %v873_v59 = vsel %vm825_vm5, -1e+09, %v867_v51 }
 0x3d9   : > { %v870_v53 = vpop.f32.mrb[2].mxu1 }
 0x3da   : > { %v1638_v54 = vpop.f32.mrb[3].mxu1 }
 0x449   : > { %v920_v57 = vpop.f32.mrb[4].mxu0  ;;  %v971_v58 = vpop.f32.mrb[4].mxu1 }
 0x44a   : > { %v926_v60 = vsel %vm825_vm5, -1e+09, %v920_v57  ;;  %v1643_v61 = vpop.f32.mrb[5].mxu0  ;;  %v1649_v62 = vpop.f32.mrb[5].mxu1  ;;  %v977_v2 = vsel %vm825_vm5, -1e+09, %v971_v58 }
 0x44b   : > { %v1029_v63 = vmax.f32 %v873_v59, %v926_v60  ;;  %v923_v0 = vpop.f32.mrb[6].mxu0  ;;  %v974_v1 = vpop.f32.mrb[6].mxu1  ;;  %v1570_v61 = vld [vmem:[%s3105_s21] ss:$0 sm:$0xff] }
 0x44c   : > { %v1644_v3 = vpop.f32.mrb[7].mxu0  ;;  %v1650_v4 = vpop.f32.mrb[7].mxu1 }
 0x44d   : > { %v1030_v5 = vmax.f32 %v1029_v63, %v977_v2 }
 0x455   : > { %v1022_v6 = vpop.f32.mrb[8].mxu0 }
 0x456   : > { %v1028_v7 = vsel %vm825_vm5, -1e+09, %v1022_v6  ;;  %v1655_v8 = vpop.f32.mrb[9].mxu0 }
 0x457   : > { %v1031_v9 = vmax.f32 %v1030_v5, %v1028_v7  ;;  %v1025_v10 = vpop.f32.mrb[10].mxu0 }
 0x458   : > { %v1656_v11 = vpop.f32.mrb[11].mxu0 }
 0x459   : > { %v1032_v12 = vsub.f32 %v873_v59, %v1031_v9  ;;  %v1035_v13 = vsub.f32 %v926_v60, %v1031_v9  ;;  %v1038_v14 = vsub.f32 %v977_v2, %v1031_v9  ;;  %v1041_v15 = vsub.f32 %v1028_v7, %v1031_v9 }
 0x45b   : > { %v1033_v16 = vmul.f32 1.442695, %v1032_v12  ;;  %v1036_v17 = vmul.f32 1.442695, %v1035_v13  ;;  %v1039_v18 = vmul.f32 1.442695, %v1038_v14 }
 0x45c   : > { %v1042_v19 = vmul.f32 1.442695, %v1041_v15 }
 0x45d   : > { %1883 = vpow2.f32 %v1033_v16 }
 0x45e   : > { %1885 = vpow2.f32 %v1036_v17 }
 0x45f   : > { %1887 = vpow2.f32 %v1039_v18 }
 0x460   : > { %1889 = vpow2.f32 %v1042_v19 }
 0x467   : > { %v1884_v20 = vpop.eup %1883 }
 0x468   : > { %v1886_v21 = vpop.eup %1885 }
 0x469   : > { %v1044_v22 = vadd.f32 %v1886_v21, %v1884_v20  ;;  %v1888_v23 = vpop.eup %1887 }
 0x46a   : > { %v1890_v25 = vpop.eup %1889 }
 0x46b   : > { %v1045_v24 = vadd.f32 %v1888_v23, %v1044_v22 }
 0x46d   : > { %v1046_v26 = vadd.f32 %v1890_v25, %v1045_v24 }
 0x46f   : > { %1891 = vrcp.f32 %v1046_v26 }
 0x479   : > { %v1892_v27 = vpop.eup %1891 }
 0x47a   : > { %v1048_v29 = vmul.f32 %v1892_v27, %v1884_v20  ;;  %v1095_v30 = vmul.f32 %v1892_v27, %v1886_v21  ;;  %v1150_v31 = vmul.f32 %v1892_v27, %v1888_v23  ;;  %v1204_v32 = vmul.f32 %v1892_v27, %v1890_v25 }
 0x47c   : > { %v1049_v34 = vpack.c.bf16 %v1048_v29, %v1048_v29  ;;  %v1096_v35 = vpack.c.bf16 %v1095_v30, %v1095_v30  ;;  %v1151_v37 = vpack.c.bf16 %v1150_v31, %v1150_v31  ;;  %v1205_v38 = vpack.c.bf16 %v1204_v32, %v1204_v32 }
 0x47e   : > { %1660 = vmatmul.mubr.msk.bf16.vlgmr.msra.gmra.mrb[8].mxu1 %vm1050_vm6, %v1049_v34  ;;  %1666 = vmatmul.mubr.msk.bf16.vlgmr.msra.gmra.mrb[12].mxu0 %vm1050_vm6, %v1096_v35 }
 0x47f   : > { %1670 = vmatpush3.bf16.msra.mxu1 %v1153_v33  ;;  %1676 = vmatpush3.bf16.msra.mxu0 %v1207_v36 }
 0x480   : > { %1671 = vmatprep.mubr.msk.bf16.mxu1 %vm2275_vm2, %v2274_v28  ;;  %1677 = vmatprep.mubr.msk.bf16.mxu0 %vm2275_vm2, %v2274_v28 }
 0x481   : > { %1681 = vmatprep.subr.bf16.mxu1 %v2274_v28 }
 0x486   : > { %1672 = vmatmul.mubr.msk.bf16.vlgmr.msra.gmra.mrb[12].mxu1 %vm1050_vm6, %v1151_v37  ;;  %1678 = vmatmul.mubr.msk.bf16.vlgmr.msra.gmra.mrb[16].mxu0 %vm1050_vm6, %v1205_v38 }
 0x487   : > { %1685 = vmatprep.mubr.msk.bf16.mxu1 %vm2275_vm2, %v2274_v28  ;;  %1682 = vmatpush3.bf16.msra.mxu1 %v1881_v39 }
 0x488   : > { %1683 = vmatprep.subr.bf16.mxu1 %v2274_v28 }
 0x48b   : > { %1684 = vmatpush3.bf16.msra.mxu1 %v1882_v40 }
 0x551   : > { %v1088_v41 = vpop.f32.mrb[8].mxu1  ;;  %v1138_v42 = vpop.f32.mrb[12].mxu0 }
 0x552   : > { %1094 = vst.msk [vmem:[#allocation4] sm:$0xff] %vm826_vm3, %v1088_v41  ;;  %v1661_v43 = vpop.f32.mrb[9].mxu1  ;;  %1145 = vrot.lane.b32.xlu1 %v1138_v42, %s2279_s25  ;;  %v1667_v44 = vpop.f32.mrb[13].mxu0  ;;  %s3106_s25 = sld [smem:[#allocation48_spill]] }
 0x553   : > { %v1091_v45 = vpop.f32.mrb[10].mxu1  ;;  %v1141_v46 = vpop.f32.mrb[14].mxu0 }
 0x554   : > { %v1662_v47 = vpop.f32.mrb[11].mxu1  ;;  %v1668_v48 = vpop.f32.mrb[15].mxu0 }
 0x559   : > { %v1192_v49 = vpop.f32.mrb[12].mxu1  ;;  %v1246_v50 = vpop.f32.mrb[16].mxu0 }
 0x55a   : > { %1199 = vrot.lane.b32.xlu0 %v1192_v49, %s2280_s17  ;;  %v1673_v51 = vpop.f32.mrb[13].mxu1  ;;  %1253 = vrot.lane.b32.xlu1 %v1246_v50, %s2281_s4  ;;  %v1679_v52 = vpop.f32.mrb[17].mxu0  ;;  %s3107_s17 = smov %s3106_s25  ;;  %s2898_s4 = scalar_lea.hbm %s3106_s25, %s1576_s19 }
 0x55b   : > { %v1195_v28 = vpop.f32.mrb[14].mxu1  ;;  %v1249_v53 = vpop.f32.mrb[18].mxu0 }
 0x55c   : > { %v1674_v54 = vpop.f32.mrb[15].mxu1  ;;  %v1680_v55 = vpop.f32.mrb[19].mxu0 }
 0x5c4   : > { %v1146_v56 = vpop.permute.xlu1 %1145 }
 0x5c5   : > { %1149 = vst.msk [vmem:[#allocation4] sm:$0xff] %vm1148_vm7, %v1146_v56 }
 0x5cc   : > { %v1200_v57 = vpop.permute.xlu0 %1199  ;;  %v1254_v58 = vpop.permute.xlu1 %1253 }
 0x5cd   : > { %1203 = vst.msk [vmem:[#allocation4] sm:$0xff] %vm1202_vm8, %v1200_v57 }
 0x5ce   : > { %1257 = vst.msk [vmem:[#allocation4] sm:$0xff] %vm1256_vm9, %v1254_v58 }
 0x5d5   : > { %v1258_v59 = vld [vmem:[#allocation4] sm:$0xff] }
 0x5d6   : > { %v1259_v60 = vpack.c.bf16 %v1258_v59, %v1258_v59 }
 0x5d8   : > { %1686 = vmatmul.mubr.msk.bf16.vlgmr.msra.gmra.mrb[16].mxu1 %vm777_vm4, %v1259_v60 }
 0x6ab   : > { %v1320_v62 = vpop.f32.mrb[16].mxu1 }
 0x6ac   : > { %v1321_v63 = vadd.f32 %v1570_v61, %v1320_v62  ;;  %v1687_v0 = vpop.f32.mrb[17].mxu1 }
 0x6ad   : > { %v1323_v1 = vpop.f32.mrb[18].mxu1 }
 0x6ae   : > { %1326 = vst.msk [vmem:[%s2811_s18] sm:$0xff] %vm777_vm4, %v1321_v63  ;;  %v1688_v2 = vpop.f32.mrb[19].mxu1 }
 0x6af   : > { %2110 = shalt.err (!%p2107_p13)
}
 0x6b0   : > { %s2111_s13 = scalar_lea.hbm %s2898_s4, 128  ;;  %s2115_s21 = scalar_lea.hbm %s3107_s17, 512 }
 0x6b1   : > { %p2112_p7 = scmp.ne.s32.totalorder %s2898_s4, %s2111_s13  ;;  %p2116_p10 = scmp.lt.u32.totalorder %s2898_s4, %s3107_s17 }
 0x6b2   : > { %p2117_p1 = scmp.lt.u32.totalorder %s2115_s21, %s2111_s13  ;;  %p2119_p5 = scmp.lt.u32.totalorder %s2111_s13, %s2898_s4 }
 0x6b3   : > { %p2113_p12 = pnand %p2112_p7, %p3108_p2 }
 0x6b4   : > { %p2118_p6 = por %p2117_p1, %p2116_p10 }
 0x6b5   : > { %p2114_p4 = pneg %p2113_p12 }
 0x6b6   : > { %p2120_p8 = por %p2119_p5, %p2118_p6 }
 0x6b8   : > { %p2121_p0 = pnand %p2120_p8, %p2114_p4 }
 0x6ba   : > { %2124 = shalt.err (!%p2121_p0)
}
 0x6bb   : > { %1709 = dma.vmem_to_hbm [thread:$0]  (%p3108_p2), %s2900_s11, 128, %s2898_s4, %s1328_s27  }
 0x6bc PF: > { %s3109_s30 = sld [smem:[#allocation28_spill]]  ;;  %s3110_s25 = sld [smem:[#allocation33_spill]] }
 0x6bd   : > { %p1745_p3 = scmp.ge.s32.totalorder %s2259_s16, 2 }
 0x6c2   : > { %s1355_s9 = sand.u32 1, %s3109_s30   ;;  %p3111_p9 = scmp.ne.s32.totalorder %s3110_s25, 0 }
 0x6c3   : > { %s1356_s12 = scalar_lea.sflag [#allocation7], %s1355_s9 }
 0x6c4   : > { %p1735_p11 = pnand %p1745_p3, %p3111_p9 }
 0x6c6   : > { %2202 = dma.done.wait (!%p1735_p11), %s1356_s12, 128  }
 0x6c7   : > { %2204 = vsyncadd (!%p1735_p11), %s1356_s12, 4294967168  ;;  %s35_s16 = sadd.s32 1, %s2259_s16   ;;  %s3113_s21 = sld [smem:[#allocation25_spill]] }
 0x6c8   : > { %p2931_p13 = scmp.ge.s32.totalorder %s35_s16, 6   ;;  %s3114_s22 = sld [smem:[#allocation26_spill]] }
 0x6c9   : > { %s3115_s24 = sld [smem:[#allocation27_spill]]  ;;  %s3116_s11 = sld [smem:[#allocation34_spill]] }
 0x6ca   : > { %s3117_s4 = sld [smem:[#allocation36_spill]]  ;;  %s3118_s23 = smov %s2716_s6 }
 0x6cb   : > { %s3119_s25 = smov %s2227_s26  ;;  %s3120_s26 = smov %s2634_s0 }
 0x6cc   : > { %s3121_s27 = smov %s2235_s28  ;;  %s3122_s28 = smov %s2239_s29 }
 0x6cd   : > { %s3123_s29 = smov %s2637_s8  ;;  %s3124_s30 = smov %s2251_s14 }
 0x6ce   : > { %s3125_s13 = smov %s2255_s15  ;;  %34 = sbr.rel (!%p2931_p13) target bundleno = 28 (0x1c), region = 166 }
 0x6cf   : > { %s3126_s14 = smov %s3116_s11 }
 0x6d0   : > { %s3127_s15 = smov %s3117_s4 }
 0x6d5   :  { %1361 = vsyncpa [#allocation6], 1 }
 0x6d6   :  { %1363 = vsyncpa [#allocation6 + $0x1], 1 }
 0x6d7   :  { %1364 = vsyncpa [#allocation9], 1 }
 0x6d8   :  { %1366 = vsyncpa [#allocation9 + $0x1], 1 }
 0x6d9   :  { %1367 = vsyncpa [#allocation12], 1 }
 0x6da   :  { %1369 = vsyncpa [#allocation12 + $0x1], 1 }
 0x6db   :  { %1370 = vsyncpa [#allocation15], 1 }
 0x6dc   :  { %1371 = vsyncpa [#allocation7], 1 }
 0x6dd   :  { %1373 = vsyncpa [#allocation7 + $0x1], 1 }

</bundles_post_ra>
